<compile_context>
chip_gen: v7x
topology: tpu7x:2x2x1
jax: 0.10.0
libtpu: 0.0.40
codegen_flags: <defaults>
</compile_context>

<pallas_src>
import functools
import math

import jax
import jax.numpy as jnp
from jax import lax
from jax.experimental import pallas as pl
from jax.experimental.pallas import tpu as pltpu


# ----------------------------------------------------------------------------
# helpers
# ----------------------------------------------------------------------------

def _round_up(x, m):
    return (x + m - 1) // m * m


def _tile(size, align, max_tile):
    """Tile size (multiple of `align`) and the padded extent it evenly divides.

    If the padded extent exceeds max_tile, the extent is padded up to a
    multiple of max_tile so the full MXU-sized tile is kept (no fallback to
    a 128-wide tile)."""
    padded = _round_up(size, align)
    if padded <= max_tile:
        return padded, padded
    padded = _round_up(padded, max_tile)
    return max_tile, padded


def _pad2(a, rows, cols):
    pr, pc = rows - a.shape[0], cols - a.shape[1]
    if pr or pc:
        a = jnp.pad(a, ((0, pr), (0, pc)))
    return a


# Fits v7x's 64 MiB physical VMEM; v5e/v6e (128 MiB) have extra headroom.
_VMEM_LIMIT = 48 * 1024 * 1024


# ----------------------------------------------------------------------------
# Pallas kernels
# ----------------------------------------------------------------------------

def _matmul_bias_kernel(x_ref, w_ref, b_ref, o_ref, acc_ref):
    """o = x @ w + b, tiled over (M, N, K); bf16 operands, f32 accumulator."""
    k = pl.program_id(2)

    @pl.when(k == 0)
    def _():
        acc_ref[...] = jnp.zeros_like(acc_ref)

    acc_ref[...] += jnp.dot(x_ref[...], w_ref[...],
                            preferred_element_type=jnp.float32)

    @pl.when(k == pl.num_programs(2) - 1)
    def _():
        o_ref[...] = (acc_ref[...] + b_ref[...].astype(jnp.float32)
                      ).astype(o_ref.dtype)


def _attn_block_kernel(x_ref, wqkv_ref, bqkv_ref, wo_ref, bo_ref, g_ref,
                       bln_ref, o_ref, *, n_heads, d_head, scale, eps):
    """Fused: qkv = x Wqkv + b; per-head softmax(q k^T) v; out-proj folded
    per head into an accumulator; + residual; LayerNorm1.  One batch/step."""
    x = x_ref[0]                                         # (S, D) f32
    xb = x.astype(jnp.bfloat16)
    qkv = jnp.dot(xb, wqkv_ref[...], preferred_element_type=jnp.float32)
    qkv = qkv + bqkv_ref[...].astype(jnp.float32)        # (S, 3D) f32
    wo = wo_ref[...]                                     # (D, D) bf16
    d_model = n_heads * d_head

    acc = jnp.zeros((x.shape[0], d_model), jnp.float32)
    for hd in range(n_heads):
        q = qkv[:, hd * d_head:(hd + 1) * d_head] * scale
        k = qkv[:, d_model + hd * d_head:d_model + (hd + 1) * d_head]
        v = qkv[:, 2 * d_model + hd * d_head:2 * d_model + (hd + 1) * d_head]
        # q @ k^T without materializing a transpose.
        s = lax.dot_general(q.astype(jnp.bfloat16), k.astype(jnp.bfloat16),
                            (((1,), (1,)), ((), ())),
                            preferred_element_type=jnp.float32)     # (S, S)
        m = jnp.max(s, axis=-1, keepdims=True)
        p = jnp.exp(s - m)
        p = p * pl.reciprocal(jnp.sum(p, axis=-1, keepdims=True), approx=True)
        o_h = lax.dot_general(p.astype(jnp.bfloat16), v.astype(jnp.bfloat16),
                              (((1,), (0,)), ((), ())),
                              preferred_element_type=jnp.float32)   # (S, dh)
        # Out-projection folded per head: sublane-aligned weight slice, no concat.
        acc = acc + jnp.dot(o_h.astype(jnp.bfloat16),
                            wo[hd * d_head:(hd + 1) * d_head, :],
                            preferred_element_type=jnp.float32)

    h = acc + bo_ref[...].astype(jnp.float32) + x        # residual add
    mean = jnp.mean(h, axis=-1, keepdims=True)
    var = jnp.mean(jnp.square(h - mean), axis=-1, keepdims=True)
    o_ref[0] = ((h - mean) * lax.rsqrt(var + eps) * g_ref[...]
                + bln_ref[...]).astype(o_ref.dtype)


def _ffn_block_kernel(x_ref, w1_ref, b1_ref, w2_ref, b2_ref, g_ref, bln_ref,
                      o_ref, *, eps):
    """Fused: relu(x W1 + b1) W2 + b2 + x, then LayerNorm2.  Row-tiled."""
    x = x_ref[...]                                       # (tm, D) f32
    h = jnp.dot(x.astype(jnp.bfloat16), w1_ref[...],
                preferred_element_type=jnp.float32)
    h = jnp.maximum(h + b1_ref[...].astype(jnp.float32), 0.0)
    y = jnp.dot(h.astype(jnp.bfloat16), w2_ref[...],
                preferred_element_type=jnp.float32)
    y = y + b2_ref[...].astype(jnp.float32) + x          # residual add
    mean = jnp.mean(y, axis=-1, keepdims=True)
    var = jnp.mean(jnp.square(y - mean), axis=-1, keepdims=True)
    o_ref[...] = ((y - mean) * lax.rsqrt(var + eps) * g_ref[...]
                  + bln_ref[...]).astype(o_ref.dtype)


def _layernorm_kernel(x_ref, g_ref, b_ref, o_ref, *, eps):
    """Row-tiled LayerNorm over the last dim (PyTorch biased variance)."""
    h = x_ref[...].astype(jnp.float32)
    mean = jnp.mean(h, axis=-1, keepdims=True)
    var = jnp.mean(jnp.square(h - mean), axis=-1, keepdims=True)
    o_ref[...] = ((h - mean) * lax.rsqrt(var + eps) * g_ref[...]
                  + b_ref[...]).astype(o_ref.dtype)


# ----------------------------------------------------------------------------
# Pallas wrappers
# ----------------------------------------------------------------------------

def linear(x, w, b):
    """x @ w + b (vocab head); tiled, bf16 MXU operands, f32 accumulation."""
    M, K = x.shape
    N = w.shape[1]
    tm, Mp = _tile(M, 8, 256)
    tn, Np = _tile(N, 128, 512)
    tk, Kp = _tile(K, 128, 512)

    xp = _pad2(x, Mp, Kp).astype(jnp.bfloat16)
    wp = _pad2(w, Kp, Np).astype(jnp.bfloat16)
    bp = _pad2(b.reshape(1, N), 1, Np)

    out = pl.pallas_call(
        _matmul_bias_kernel,
        out_shape=jax.ShapeDtypeStruct((Mp, Np), jnp.float32),
        grid=(Mp // tm, Np // tn, Kp // tk),
        in_specs=[
            pl.BlockSpec((tm, tk), lambda i, j, k: (i, k)),
            pl.BlockSpec((tk, tn), lambda i, j, k: (k, j)),
            pl.BlockSpec((1, tn), lambda i, j, k: (0, j)),
        ],
        out_specs=pl.BlockSpec((tm, tn), lambda i, j, k: (i, j)),
        scratch_shapes=[pltpu.VMEM((tm, tn), jnp.float32)],
        compiler_params=pltpu.CompilerParams(
            dimension_semantics=("parallel", "parallel", "arbitrary"),
            vmem_limit_bytes=_VMEM_LIMIT),
    )(xp, wp, bp)
    if Mp != M or Np != N:
        out = out[:M, :N]
    return out


def attn_block(x, wqkv, bqkv, wo, bo, gamma, beta, n_heads, eps=1e-5):
    """Fused attention block per layer, grid over batch (parallel)."""
    B, S, D = x.shape
    d_head = D // n_heads
    kern = functools.partial(_attn_block_kernel, n_heads=n_heads,
                             d_head=d_head, scale=1.0 / math.sqrt(d_head),
                             eps=eps)
    # TODO(synk): for large d_model / long S (weights or S^2 scores exceeding
    # VMEM, esp. v7x's 64 MiB) fall back to K/N-tiled matmuls + flash-style
    # KV-tiled attention with an online-softmax accumulator.
    return pl.pallas_call(
        kern,
        out_shape=jax.ShapeDtypeStruct((B, S, D), jnp.float32),
        grid=(B,),
        in_specs=[
            pl.BlockSpec((1, S, D), lambda b: (b, 0, 0)),
            pl.BlockSpec((D, 3 * D), lambda b: (0, 0)),
            pl.BlockSpec((1, 3 * D), lambda b: (0, 0)),
            pl.BlockSpec((D, D), lambda b: (0, 0)),
            pl.BlockSpec((1, D), lambda b: (0, 0)),
            pl.BlockSpec((1, D), lambda b: (0, 0)),
            pl.BlockSpec((1, D), lambda b: (0, 0)),
        ],
        out_specs=pl.BlockSpec((1, S, D), lambda b: (b, 0, 0)),
        compiler_params=pltpu.CompilerParams(
            dimension_semantics=("parallel",),
            vmem_limit_bytes=_VMEM_LIMIT),
    )(x, wqkv.astype(jnp.bfloat16), bqkv.reshape(1, -1),
      wo.astype(jnp.bfloat16), bo.reshape(1, -1),
      gamma.reshape(1, -1), beta.reshape(1, -1))


def ffn_block(x, w1, b1, w2, b2, gamma, beta, eps=1e-5):
    """Fused FFN block per layer, grid over row tiles (parallel)."""
    M, D = x.shape
    F = w1.shape[1]
    tm, Mp = _tile(M, 8, 256)
    xp = _pad2(x, Mp, D)
    out = pl.pallas_call(
        functools.partial(_ffn_block_kernel, eps=eps),
        out_shape=jax.ShapeDtypeStruct((Mp, D), jnp.float32),
        grid=(Mp // tm,),
        in_specs=[
            pl.BlockSpec((tm, D), lambda i: (i, 0)),
            pl.BlockSpec((D, F), lambda i: (0, 0)),
            pl.BlockSpec((1, F), lambda i: (0, 0)),
            pl.BlockSpec((F, D), lambda i: (0, 0)),
            pl.BlockSpec((1, D), lambda i: (0, 0)),
            pl.BlockSpec((1, D), lambda i: (0, 0)),
            pl.BlockSpec((1, D), lambda i: (0, 0)),
        ],
        out_specs=pl.BlockSpec((tm, D), lambda i: (i, 0)),
        compiler_params=pltpu.CompilerParams(
            dimension_semantics=("parallel",),
            vmem_limit_bytes=_VMEM_LIMIT),
    )(xp, w1.astype(jnp.bfloat16), b1.reshape(1, -1),
      w2.astype(jnp.bfloat16), b2.reshape(1, -1),
      gamma.reshape(1, -1), beta.reshape(1, -1))
    if Mp != M:
        out = out[:M]
    return out


def layernorm(x, gamma, beta, eps=1e-5):
    """Final row-tiled LayerNorm."""
    M, D = x.shape
    tm, Mp = _tile(M, 8, 512)
    xp = _pad2(x, Mp, D)
    out = pl.pallas_call(
        functools.partial(_layernorm_kernel, eps=eps),
        out_shape=jax.ShapeDtypeStruct((Mp, D), jnp.float32),
        grid=(Mp // tm,),
        in_specs=[
            pl.BlockSpec((tm, D), lambda i: (i, 0)),
            pl.BlockSpec((1, D), lambda i: (0, 0)),
            pl.BlockSpec((1, D), lambda i: (0, 0)),
        ],
        out_specs=pl.BlockSpec((tm, D), lambda i: (i, 0)),
        compiler_params=pltpu.CompilerParams(
            dimension_semantics=("parallel",),
            vmem_limit_bytes=_VMEM_LIMIT),
    )(xp, gamma.reshape(1, D), beta.reshape(1, D))
    if Mp != M:
        out = out[:M]
    return out


# ----------------------------------------------------------------------------
# GPT forward (embedding gather stays in XLA glue; hot paths in Pallas)
# ----------------------------------------------------------------------------

def encoder_layer(x, p, n_heads):
    B, S, D = x.shape
    h = attn_block(x, p["w_qkv"], p["b_qkv"], p["w_o"], p["b_o"],
                   p["ln1_g"], p["ln1_b"], n_heads)
    h2 = ffn_block(h.reshape(B * S, D), p["w_ff1"], p["b_ff1"],
                   p["w_ff2"], p["b_ff2"], p["ln2_g"], p["ln2_b"])
    return h2.reshape(B, S, D)


def gpt_forward(tokens, params, n_heads):
    B, S = tokens.shape
    D = params["token_emb"].shape[1]
    # TODO(synk): embedding gather (jnp.take) is left to XLA glue; eval-mode
    # dropout is the identity.
    tok = jnp.take(params["token_emb"], tokens, axis=0)          # (B, S, D)
    h = tok + params["pos_emb"][:, :S, :]
    for lp in params["layers"]:
        h = encoder_layer(h, lp, n_heads)
    h = layernorm(h.reshape(B * S, D), params["lnf_g"], params["lnf_b"])
    logits = linear(h, params["head_w"], params["head_b"])       # (B*S, V)
    return logits.reshape(B, S, -1)


# ----------------------------------------------------------------------------
# Pure-JAX reference (bf16 matmul operands, f32 accumulation — matches kernels)
# ----------------------------------------------------------------------------

def _ref_layernorm(h, g, b, eps=1e-5):
    m = jnp.mean(h, -1, keepdims=True)
    v = jnp.mean(jnp.square(h - m), -1, keepdims=True)
    return (h - m) / jnp.sqrt(v + eps) * g + b


def _bf16_dot(a, w):
    return jnp.dot(a.astype(jnp.bfloat16), w.astype(jnp.bfloat16),
                   preferred_element_type=jnp.float32)


def gpt_reference(tokens, params, n_heads):
    B, S = tokens.shape
    D = params["token_emb"].shape[1]
    Dh = D // n_heads
    h = jnp.take(params["token_emb"], tokens, axis=0) + params["pos_emb"][:, :S, :]
    for p in params["layers"]:
        x2 = h.reshape(B * S, D)
        qkv = _bf16_dot(x2, p["w_qkv"]) + p["b_qkv"]
        q, k, v = jnp.split(qkv, 3, -1)

        def heads(t):
            return t.reshape(B, S, n_heads, Dh).transpose(0, 2, 1, 3)

        q, k, v = heads(q * (1.0 / math.sqrt(Dh))), heads(k), heads(v)
        s = jnp.einsum("bhqd,bhkd->bhqk", q.astype(jnp.bfloat16),
                       k.astype(jnp.bfloat16), preferred_element_type=jnp.float32)
        a = jax.nn.softmax(s, -1)
        o = jnp.einsum("bhqk,bhkd->bhqd", a.astype(jnp.bfloat16),
                       v.astype(jnp.bfloat16), preferred_element_type=jnp.float32)
        o = o.transpose(0, 2, 1, 3).reshape(B * S, D)
        o = _bf16_dot(o, p["w_o"]) + p["b_o"]
        h = _ref_layernorm(h + o.reshape(B, S, D), p["ln1_g"], p["ln1_b"])
        f = jnp.maximum(_bf16_dot(h.reshape(B * S, D), p["w_ff1"]) + p["b_ff1"], 0.0)
        f = _bf16_dot(f, p["w_ff2"]) + p["b_ff2"]
        h = _ref_layernorm(h + f.reshape(B, S, D), p["ln2_g"], p["ln2_b"])
    h = _ref_layernorm(h, params["lnf_g"], params["lnf_b"])
    return (_bf16_dot(h.reshape(B * S, D), params["head_w"])
            + params["head_b"]).reshape(B, S, -1)


# ----------------------------------------------------------------------------
# Deterministic parameter init + main
# ----------------------------------------------------------------------------

def init_params(key, vocab_size, seq_len, d_model, n_heads, n_layers, d_ff):
    keys = jax.random.split(key, 4 + 6 * n_layers)
    kit = iter(keys)

    def nrm(k, shape, scale=0.02):
        return (scale * jax.random.normal(k, shape)).astype(jnp.float32)

    params = {
        "token_emb": nrm(next(kit), (vocab_size, d_model)),
        "pos_emb": nrm(next(kit), (1, seq_len, d_model)),
        "lnf_g": jnp.ones((d_model,), jnp.float32),
        "lnf_b": jnp.zeros((d_model,), jnp.float32),
        "head_w": nrm(next(kit), (d_model, vocab_size)),
        "head_b": jnp.zeros((vocab_size,), jnp.float32),
        "layers": [],
    }
    for _ in range(n_layers):
        lp = {
            "w_qkv": nrm(next(kit), (d_model, 3 * d_model)),
            "b_qkv": jnp.zeros((3 * d_model,), jnp.float32),
            "w_o": nrm(next(kit), (d_model, d_model)),
            "b_o": jnp.zeros((d_model,), jnp.float32),
            "ln1_g": jnp.ones((d_model,), jnp.float32),
            "ln1_b": jnp.zeros((d_model,), jnp.float32),
            "w_ff1": nrm(next(kit), (d_model, d_ff)),
            "b_ff1": jnp.zeros((d_ff,), jnp.float32),
            "w_ff2": nrm(next(kit), (d_ff, d_model)),
            "b_ff2": jnp.zeros((d_model,), jnp.float32),
            "ln2_g": jnp.ones((d_model,), jnp.float32),
            "ln2_b": jnp.zeros((d_model,), jnp.float32),
        }
        params["layers"].append(lp)
    return params


if __name__ == "__main__":
    # Small, lane-friendly shapes consistent with the module's forward.
    VOCAB, SEQ_LEN, D_MODEL, N_HEADS, N_LAYERS, D_FF = 256, 16, 128, 4, 2, 256
    BATCH = 2

    key = jax.random.PRNGKey(0)
    pkey, tkey = jax.random.split(key)
    params = init_params(pkey, VOCAB, SEQ_LEN, D_MODEL, N_HEADS, N_LAYERS, D_FF)
    tokens = jax.random.randint(tkey, (BATCH, SEQ_LEN), 0, VOCAB, dtype=jnp.int32)

    fwd = jax.jit(functools.partial(gpt_forward, n_heads=N_HEADS))
    logits = jax.block_until_ready(fwd(tokens, params))

    assert logits.shape == (BATCH, SEQ_LEN, VOCAB), logits.shape

    # Sanity check against a pure-JAX reference using the same bf16 matmul
    # operands / f32 accumulation as the kernels.
    ref = jax.block_until_ready(gpt_reference(tokens, params, N_HEADS))
    max_err = float(jnp.max(jnp.abs(logits - ref)))
    assert jnp.allclose(logits, ref, rtol=1e-2, atol=1e-2), max_err

    print("KERNEL_OK")
</pallas_src>

<mosaic_0001>
module attributes {stable_mosaic.version = 11 : i64} {
  func.func @_ffn_block_kernel(%arg0: i32, %arg1: memref<32x128xf32, #tpu.memory_space<vmem>>, %arg2: memref<128x256xbf16, #tpu.memory_space<vmem>>, %arg3: memref<1x256xf32, #tpu.memory_space<vmem>>, %arg4: memref<256x128xbf16, #tpu.memory_space<vmem>>, %arg5: memref<1x128xf32, #tpu.memory_space<vmem>>, %arg6: memref<1x128xf32, #tpu.memory_space<vmem>>, %arg7: memref<1x128xf32, #tpu.memory_space<vmem>>, %arg8: memref<32x128xf32, #tpu.memory_space<vmem>>) attributes {dimension_semantics = [#tpu.dimension_semantics<parallel>], iteration_bounds = array<i64: 1>, scalar_prefetch = 0 : i64, scratch_operands = 0 : i64, tpu.core_type = #tpu.core_type<tc>, window_params = [{transform_indices = @transform_0, window_bounds = array<i64: 32, 128>}, {pipeline_mode = #tpu.pipeline_mode<synchronous>, transform_indices = @transform_1, window_bounds = array<i64: 128, 256>}, {pipeline_mode = #tpu.pipeline_mode<synchronous>, transform_indices = @transform_2, window_bounds = array<i64: 1, 256>}, {pipeline_mode = #tpu.pipeline_mode<synchronous>, transform_indices = @transform_3, window_bounds = array<i64: 256, 128>}, {pipeline_mode = #tpu.pipeline_mode<synchronous>, transform_indices = @transform_4, window_bounds = array<i64: 1, 128>}, {pipeline_mode = #tpu.pipeline_mode<synchronous>, transform_indices = @transform_5, window_bounds = array<i64: 1, 128>}, {pipeline_mode = #tpu.pipeline_mode<synchronous>, transform_indices = @transform_6, window_bounds = array<i64: 1, 128>}, {transform_indices = @transform_7, window_bounds = array<i64: 32, 128>}]} {
    %c0 = arith.constant 0 : index
    %c0_0 = arith.constant 0 : index
    %0 = vector.load %arg1[%c0, %c0_0] : memref<32x128xf32, #tpu.memory_space<vmem>>, vector<32x128xf32>
    %1 = arith.truncf %0 : vector<32x128xf32> to vector<32x128xbf16>
    %c0_1 = arith.constant 0 : index
    %c0_2 = arith.constant 0 : index
    %2 = vector.load %arg2[%c0_1, %c0_2] : memref<128x256xbf16, #tpu.memory_space<vmem>>, vector<128x256xbf16>
    %cst = arith.constant dense<0.000000e+00> : vector<32x256xf32>
    %3 = tpu.matmul %1, %2, %cst {dimension_numbers = #tpu.dot_dimension_numbers<[1], [0], [0], [1], [0, 0, 1, 1], [], []>} : vector<32x128xbf16>, vector<128x256xbf16>, vector<32x256xf32> -> vector<32x256xf32>
    %c0_3 = arith.constant 0 : index
    %c0_4 = arith.constant 0 : index
    %4 = vector.load %arg3[%c0_3, %c0_4] : memref<1x256xf32, #tpu.memory_space<vmem>>, vector<1x256xf32>
    %5 = vector.broadcast %4 : vector<1x256xf32> to vector<32x256xf32>
    %6 = arith.addf %3, %5 : vector<32x256xf32>
    %cst_5 = arith.constant 0.000000e+00 : f32
    %7 = vector.broadcast %cst_5 : f32 to vector<32x256xf32>
    %8 = arith.maximumf %6, %7 : vector<32x256xf32>
    %9 = arith.truncf %8 : vector<32x256xf32> to vector<32x256xbf16>
    %c0_6 = arith.constant 0 : index
    %c0_7 = arith.constant 0 : index
    %10 = vector.load %arg4[%c0_6, %c0_7] : memref<256x128xbf16, #tpu.memory_space<vmem>>, vector<256x128xbf16>
    %cst_8 = arith.constant dense<0.000000e+00> : vector<32x128xf32>
    %11 = tpu.matmul %9, %10, %cst_8 {dimension_numbers = #tpu.dot_dimension_numbers<[1], [0], [0], [1], [0, 0, 1, 1], [], []>} : vector<32x256xbf16>, vector<256x128xbf16>, vector<32x128xf32> -> vector<32x128xf32>
    %c0_9 = arith.constant 0 : index
    %c0_10 = arith.constant 0 : index
    %12 = vector.load %arg5[%c0_9, %c0_10] : memref<1x128xf32, #tpu.memory_space<vmem>>, vector<1x128xf32>
    %13 = vector.broadcast %12 : vector<1x128xf32> to vector<32x128xf32>
    %14 = arith.addf %11, %13 : vector<32x128xf32>
    %15 = arith.addf %14, %0 : vector<32x128xf32>
    %cst_11 = arith.constant dense<0.000000e+00> : vector<32xf32>
    %16 = vector.multi_reduction <add>, %15, %cst_11 [1] : vector<32x128xf32> to vector<32xf32>
    %17 = vector.shape_cast %16 : vector<32xf32> to vector<32x1xf32>
    %cst_12 = arith.constant 1.280000e+02 : f32
    %18 = vector.broadcast %cst_12 : f32 to vector<32x1xf32>
    %19 = arith.divf %17, %18 : vector<32x1xf32>
    %20 = vector.broadcast %19 : vector<32x1xf32> to vector<32x128xf32>
    %21 = arith.subf %15, %20 : vector<32x128xf32>
    %22 = arith.mulf %21, %21 : vector<32x128xf32>
    %cst_13 = arith.constant dense<0.000000e+00> : vector<32xf32>
    %23 = vector.multi_reduction <add>, %22, %cst_13 [1] : vector<32x128xf32> to vector<32xf32>
    %24 = vector.shape_cast %23 : vector<32xf32> to vector<32x1xf32>
    %cst_14 = arith.constant 1.280000e+02 : f32
    %25 = vector.broadcast %cst_14 : f32 to vector<32x1xf32>
    %26 = arith.divf %24, %25 : vector<32x1xf32>
    %27 = vector.broadcast %19 : vector<32x1xf32> to vector<32x128xf32>
    %28 = arith.subf %15, %27 : vector<32x128xf32>
    %cst_15 = arith.constant 9.99999974E-6 : f32
    %29 = vector.broadcast %cst_15 : f32 to vector<32x1xf32>
    %30 = arith.addf %26, %29 : vector<32x1xf32>
    %31 = math.rsqrt %30 : vector<32x1xf32>
    %32 = vector.broadcast %31 : vector<32x1xf32> to vector<32x128xf32>
    %33 = arith.mulf %28, %32 : vector<32x128xf32>
    %c0_16 = arith.constant 0 : index
    %c0_17 = arith.constant 0 : index
    %34 = vector.load %arg6[%c0_16, %c0_17] : memref<1x128xf32, #tpu.memory_space<vmem>>, vector<1x128xf32>
    %35 = vector.broadcast %34 : vector<1x128xf32> to vector<32x128xf32>
    %36 = arith.mulf %33, %35 : vector<32x128xf32>
    %c0_18 = arith.constant 0 : index
    %c0_19 = arith.constant 0 : index
    %37 = vector.load %arg7[%c0_18, %c0_19] : memref<1x128xf32, #tpu.memory_space<vmem>>, vector<1x128xf32>
    %38 = vector.broadcast %37 : vector<1x128xf32> to vector<32x128xf32>
    %39 = arith.addf %36, %38 : vector<32x128xf32>
    %c0_20 = arith.constant 0 : index
    %c0_21 = arith.constant 0 : index
    %40 = vector.load %arg8[%c0_20, %c0_21] : memref<32x128xf32, #tpu.memory_space<vmem>>, vector<32x128xf32>
    tpu.vector_store %arg8[%c0_20, %c0_21], %39 {strides = array<i32>} : memref<32x128xf32, #tpu.memory_space<vmem>>, vector<32x128xf32>,
    return
  }
  func.func @transform_0(%arg0: i32) -> (i32, i32) {
    %c0_i32 = arith.constant 0 : i32
    %c0_i32_0 = arith.constant 0 : i32
    return %arg0, %c0_i32 : i32, i32
  }
  func.func @transform_1(%arg0: i32) -> (i32, i32) {
    %c0_i32 = arith.constant 0 : i32
    %c0_i32_0 = arith.constant 0 : i32
    %c0_i32_1 = arith.constant 0 : i32
    return %c0_i32, %c0_i32_0 : i32, i32
  }
  func.func @transform_2(%arg0: i32) -> (i32, i32) {
    %c0_i32 = arith.constant 0 : i32
    %c0_i32_0 = arith.constant 0 : i32
    %c0_i32_1 = arith.constant 0 : i32
    return %c0_i32, %c0_i32_0 : i32, i32
  }
  func.func @transform_3(%arg0: i32) -> (i32, i32) {
    %c0_i32 = arith.constant 0 : i32
    %c0_i32_0 = arith.constant 0 : i32
    %c0_i32_1 = arith.constant 0 : i32
    return %c0_i32, %c0_i32_0 : i32, i32
  }
  func.func @transform_4(%arg0: i32) -> (i32, i32) {
    %c0_i32 = arith.constant 0 : i32
    %c0_i32_0 = arith.constant 0 : i32
    %c0_i32_1 = arith.constant 0 : i32
    return %c0_i32, %c0_i32_0 : i32, i32
  }
  func.func @transform_5(%arg0: i32) -> (i32, i32) {
    %c0_i32 = arith.constant 0 : i32
    %c0_i32_0 = arith.constant 0 : i32
    %c0_i32_1 = arith.constant 0 : i32
    return %c0_i32, %c0_i32_0 : i32, i32
  }
  func.func @transform_6(%arg0: i32) -> (i32, i32) {
    %c0_i32 = arith.constant 0 : i32
    %c0_i32_0 = arith.constant 0 : i32
    %c0_i32_1 = arith.constant 0 : i32
    return %c0_i32, %c0_i32_0 : i32, i32
  }
  func.func @transform_7(%arg0: i32) -> (i32, i32) {
    %c0_i32 = arith.constant 0 : i32
    %c0_i32_0 = arith.constant 0 : i32
    return %arg0, %c0_i32 : i32, i32
  }
}

module attributes {stable_mosaic.version = 11 : i64} {
  func.func @_attn_block_kernel(%arg0: i32, %arg1: memref<1x16x128xf32, #tpu.memory_space<vmem>>, %arg2: memref<128x384xbf16, #tpu.memory_space<vmem>>, %arg3: memref<1x384xf32, #tpu.memory_space<vmem>>, %arg4: memref<128x128xbf16, #tpu.memory_space<vmem>>, %arg5: memref<1x128xf32, #tpu.memory_space<vmem>>, %arg6: memref<1x128xf32, #tpu.memory_space<vmem>>, %arg7: memref<1x128xf32, #tpu.memory_space<vmem>>, %arg8: memref<1x16x128xf32, #tpu.memory_space<vmem>>) attributes {dimension_semantics = [#tpu.dimension_semantics<parallel>], iteration_bounds = array<i64: 2>, scalar_prefetch = 0 : i64, scratch_operands = 0 : i64, tpu.core_type = #tpu.core_type<tc>, window_params = [{transform_indices = @transform_0, window_bounds = array<i64: 1, 16, 128>}, {pipeline_mode = #tpu.pipeline_mode<synchronous>, transform_indices = @transform_1, window_bounds = array<i64: 128, 384>}, {pipeline_mode = #tpu.pipeline_mode<synchronous>, transform_indices = @transform_2, window_bounds = array<i64: 1, 384>}, {pipeline_mode = #tpu.pipeline_mode<synchronous>, transform_indices = @transform_3, window_bounds = array<i64: 128, 128>}, {pipeline_mode = #tpu.pipeline_mode<synchronous>, transform_indices = @transform_4, window_bounds = array<i64: 1, 128>}, {pipeline_mode = #tpu.pipeline_mode<synchronous>, transform_indices = @transform_5, window_bounds = array<i64: 1, 128>}, {pipeline_mode = #tpu.pipeline_mode<synchronous>, transform_indices = @transform_6, window_bounds = array<i64: 1, 128>}, {transform_indices = @transform_7, window_bounds = array<i64: 1, 16, 128>}]} {
    %c0 = arith.constant 0 : index
    %c0_0 = arith.constant 0 : index
    %c0_1 = arith.constant 0 : index
    %0 = vector.load %arg1[%c0, %c0_0, %c0_1] : memref<1x16x128xf32, #tpu.memory_space<vmem>>, vector<1x16x128xf32>
    %1 = vector.shape_cast %0 : vector<1x16x128xf32> to vector<16x128xf32>
    %2 = arith.truncf %1 : vector<16x128xf32> to vector<16x128xbf16>
    %c0_2 = arith.constant 0 : index
    %c0_3 = arith.constant 0 : index
    %3 = vector.load %arg2[%c0_2, %c0_3] : memref<128x384xbf16, #tpu.memory_space<vmem>>, vector<128x384xbf16>
    %cst = arith.constant dense<0.000000e+00> : vector<16x384xf32>
    %4 = tpu.matmul %2, %3, %cst {dimension_numbers = #tpu.dot_dimension_numbers<[1], [0], [0], [1], [0, 0, 1, 1], [], []>} : vector<16x128xbf16>, vector<128x384xbf16>, vector<16x384xf32> -> vector<16x384xf32>
    %c0_4 = arith.constant 0 : index
    %c0_5 = arith.constant 0 : index
    %5 = vector.load %arg3[%c0_4, %c0_5] : memref<1x384xf32, #tpu.memory_space<vmem>>, vector<1x384xf32>
    %6 = vector.broadcast %5 : vector<1x384xf32> to vector<16x384xf32>
    %7 = arith.addf %4, %6 : vector<16x384xf32>
    %c0_6 = arith.constant 0 : index
    %c0_7 = arith.constant 0 : index
    %8 = vector.load %arg4[%c0_6, %c0_7] : memref<128x128xbf16, #tpu.memory_space<vmem>>, vector<128x128xbf16>
    %cst_8 = arith.constant 0.000000e+00 : f32
    %9 = vector.broadcast %cst_8 : f32 to vector<16x128xf32>
    %10 = vector.extract_strided_slice %7 {offsets = [0, 0], sizes = [16, 32], strides = [1, 1]} : vector<16x384xf32> to vector<16x32xf32>
    %cst_9 = arith.constant 0.176776692 : f32
    %11 = vector.broadcast %cst_9 : f32 to vector<16x32xf32>
    %12 = arith.mulf %10, %11 : vector<16x32xf32>
    %13 = vector.extract_strided_slice %7 {offsets = [0, 128], sizes = [16, 32], strides = [1, 1]} : vector<16x384xf32> to vector<16x32xf32>
    %14 = vector.extract_strided_slice %7 {offsets = [0, 256], sizes = [16, 32], strides = [1, 1]} : vector<16x384xf32> to vector<16x32xf32>
    %15 = arith.truncf %12 : vector<16x32xf32> to vector<16x32xbf16>
    %16 = arith.truncf %13 : vector<16x32xf32> to vector<16x32xbf16>
    %cst_10 = arith.constant dense<0.000000e+00> : vector<16x16xf32>
    %17 = tpu.matmul %15, %16, %cst_10 {dimension_numbers = #tpu.dot_dimension_numbers<[1], [1], [0], [0], [0, 0, 1, 0], [], []>} : vector<16x32xbf16>, vector<16x32xbf16>, vector<16x16xf32> -> vector<16x16xf32>
    %cst_11 = arith.constant dense<0xFF800000> : vector<16xf32>
    %18 = vector.multi_reduction <maximumf>, %17, %cst_11 [1] : vector<16x16xf32> to vector<16xf32>
    %19 = vector.shape_cast %18 : vector<16xf32> to vector<16x1xf32>
    %20 = vector.broadcast %19 : vector<16x1xf32> to vector<16x16xf32>
    %21 = arith.subf %17, %20 : vector<16x16xf32>
    %22 = math.exp %21 : vector<16x16xf32>
    %cst_12 = arith.constant dense<0.000000e+00> : vector<16xf32>
    %23 = vector.multi_reduction <add>, %22, %cst_12 [1] : vector<16x16xf32> to vector<16xf32>
    %24 = vector.shape_cast %23 : vector<16xf32> to vector<16x1xf32>
    %25 = tpu.reciprocal %24 {approx = true} : vector<16x1xf32> -> vector<16x1xf32>
    %26 = vector.broadcast %25 : vector<16x1xf32> to vector<16x16xf32>
    %27 = arith.mulf %22, %26 : vector<16x16xf32>
    %28 = arith.truncf %27 : vector<16x16xf32> to vector<16x16xbf16>
    %29 = arith.truncf %14 : vector<16x32xf32> to vector<16x32xbf16>
    %cst_13 = arith.constant dense<0.000000e+00> : vector<16x32xf32>
    %30 = tpu.matmul %28, %29, %cst_13 {dimension_numbers = #tpu.dot_dimension_numbers<[1], [0], [0], [1], [0, 0, 1, 1], [], []>} : vector<16x16xbf16>, vector<16x32xbf16>, vector<16x32xf32> -> vector<16x32xf32>
    %31 = arith.truncf %30 : vector<16x32xf32> to vector<16x32xbf16>
    %32 = vector.extract_strided_slice %8 {offsets = [0, 0], sizes = [32, 128], strides = [1, 1]} : vector<128x128xbf16> to vector<32x128xbf16>
    %cst_14 = arith.constant dense<0.000000e+00> : vector<16x128xf32>
    %33 = tpu.matmul %31, %32, %cst_14 {dimension_numbers = #tpu.dot_dimension_numbers<[1], [0], [0], [1], [0, 0, 1, 1], [], []>} : vector<16x32xbf16>, vector<32x128xbf16>, vector<16x128xf32> -> vector<16x128xf32>
    %34 = arith.addf %9, %33 : vector<16x128xf32>
    %35 = vector.extract_strided_slice %7 {offsets = [0, 32], sizes = [16, 32], strides = [1, 1]} : vector<16x384xf32> to vector<16x32xf32>
    %cst_15 = arith.constant 0.176776692 : f32
    %36 = vector.broadcast %cst_15 : f32 to vector<16x32xf32>
    %37 = arith.mulf %35, %36 : vector<16x32xf32>
    %38 = vector.extract_strided_slice %7 {offsets = [0, 160], sizes = [16, 32], strides = [1, 1]} : vector<16x384xf32> to vector<16x32xf32>
    %39 = vector.extract_strided_slice %7 {offsets = [0, 288], sizes = [16, 32], strides = [1, 1]} : vector<16x384xf32> to vector<16x32xf32>
    %40 = arith.truncf %37 : vector<16x32xf32> to vector<16x32xbf16>
    %41 = arith.truncf %38 : vector<16x32xf32> to vector<16x32xbf16>
    %cst_16 = arith.constant dense<0.000000e+00> : vector<16x16xf32>
    %42 = tpu.matmul %40, %41, %cst_16 {dimension_numbers = #tpu.dot_dimension_numbers<[1], [1], [0], [0], [0, 0, 1, 0], [], []>} : vector<16x32xbf16>, vector<16x32xbf16>, vector<16x16xf32> -> vector<16x16xf32>
    %cst_17 = arith.constant dense<0xFF800000> : vector<16xf32>
    %43 = vector.multi_reduction <maximumf>, %42, %cst_17 [1] : vector<16x16xf32> to vector<16xf32>
    %44 = vector.shape_cast %43 : vector<16xf32> to vector<16x1xf32>
    %45 = vector.broadcast %44 : vector<16x1xf32> to vector<16x16xf32>
    %46 = arith.subf %42, %45 : vector<16x16xf32>
    %47 = math.exp %46 : vector<16x16xf32>
    %cst_18 = arith.constant dense<0.000000e+00> : vector<16xf32>
    %48 = vector.multi_reduction <add>, %47, %cst_18 [1] : vector<16x16xf32> to vector<16xf32>
    %49 = vector.shape_cast %48 : vector<16xf32> to vector<16x1xf32>
    %50 = tpu.reciprocal %49 {approx = true} : vector<16x1xf32> -> vector<16x1xf32>
    %51 = vector.broadcast %50 : vector<16x1xf32> to vector<16x16xf32>
    %52 = arith.mulf %47, %51 : vector<16x16xf32>
    %53 = arith.truncf %52 : vector<16x16xf32> to vector<16x16xbf16>
    %54 = arith.truncf %39 : vector<16x32xf32> to vector<16x32xbf16>
    %cst_19 = arith.constant dense<0.000000e+00> : vector<16x32xf32>
    %55 = tpu.matmul %53, %54, %cst_19 {dimension_numbers = #tpu.dot_dimension_numbers<[1], [0], [0], [1], [0, 0, 1, 1], [], []>} : vector<16x16xbf16>, vector<16x32xbf16>, vector<16x32xf32> -> vector<16x32xf32>
    %56 = arith.truncf %55 : vector<16x32xf32> to vector<16x32xbf16>
    %57 = vector.extract_strided_slice %8 {offsets = [32, 0], sizes = [32, 128], strides = [1, 1]} : vector<128x128xbf16> to vector<32x128xbf16>
    %cst_20 = arith.constant dense<0.000000e+00> : vector<16x128xf32>
    %58 = tpu.matmul %56, %57, %cst_20 {dimension_numbers = #tpu.dot_dimension_numbers<[1], [0], [0], [1], [0, 0, 1, 1], [], []>} : vector<16x32xbf16>, vector<32x128xbf16>, vector<16x128xf32> -> vector<16x128xf32>
    %59 = arith.addf %34, %58 : vector<16x128xf32>
    %60 = vector.extract_strided_slice %7 {offsets = [0, 64], sizes = [16, 32], strides = [1, 1]} : vector<16x384xf32> to vector<16x32xf32>
    %cst_21 = arith.constant 0.176776692 : f32
    %61 = vector.broadcast %cst_21 : f32 to vector<16x32xf32>
    %62 = arith.mulf %60, %61 : vector<16x32xf32>
    %63 = vector.extract_strided_slice %7 {offsets = [0, 192], sizes = [16, 32], strides = [1, 1]} : vector<16x384xf32> to vector<16x32xf32>
    %64 = vector.extract_strided_slice %7 {offsets = [0, 320], sizes = [16, 32], strides = [1, 1]} : vector<16x384xf32> to vector<16x32xf32>
    %65 = arith.truncf %62 : vector<16x32xf32> to vector<16x32xbf16>
    %66 = arith.truncf %63 : vector<16x32xf32> to vector<16x32xbf16>
    %cst_22 = arith.constant dense<0.000000e+00> : vector<16x16xf32>
    %67 = tpu.matmul %65, %66, %cst_22 {dimension_numbers = #tpu.dot_dimension_numbers<[1], [1], [0], [0], [0, 0, 1, 0], [], []>} : vector<16x32xbf16>, vector<16x32xbf16>, vector<16x16xf32> -> vector<16x16xf32>
    %cst_23 = arith.constant dense<0xFF800000> : vector<16xf32>
    %68 = vector.multi_reduction <maximumf>, %67, %cst_23 [1] : vector<16x16xf32> to vector<16xf32>
    %69 = vector.shape_cast %68 : vector<16xf32> to vector<16x1xf32>
    %70 = vector.broadcast %69 : vector<16x1xf32> to vector<16x16xf32>
    %71 = arith.subf %67, %70 : vector<16x16xf32>
    %72 = math.exp %71 : vector<16x16xf32>
    %cst_24 = arith.constant dense<0.000000e+00> : vector<16xf32>
    %73 = vector.multi_reduction <add>, %72, %cst_24 [1] : vector<16x16xf32> to vector<16xf32>
    %74 = vector.shape_cast %73 : vector<16xf32> to vector<16x1xf32>
    %75 = tpu.reciprocal %74 {approx = true} : vector<16x1xf32> -> vector<16x1xf32>
    %76 = vector.broadcast %75 : vector<16x1xf32> to vector<16x16xf32>
    %77 = arith.mulf %72, %76 : vector<16x16xf32>
    %78 = arith.truncf %77 : vector<16x16xf32> to vector<16x16xbf16>
    %79 = arith.truncf %64 : vector<16x32xf32> to vector<16x32xbf16>
    %cst_25 = arith.constant dense<0.000000e+00> : vector<16x32xf32>
    %80 = tpu.matmul %78, %79, %cst_25 {dimension_numbers = #tpu.dot_dimension_numbers<[1], [0], [0], [1], [0, 0, 1, 1], [], []>} : vector<16x16xbf16>, vector<16x32xbf16>, vector<16x32xf32> -> vector<16x32xf32>
    %81 = arith.truncf %80 : vector<16x32xf32> to vector<16x32xbf16>
    %82 = vector.extract_strided_slice %8 {offsets = [64, 0], sizes = [32, 128], strides = [1, 1]} : vector<128x128xbf16> to vector<32x128xbf16>
    %cst_26 = arith.constant dense<0.000000e+00> : vector<16x128xf32>
    %83 = tpu.matmul %81, %82, %cst_26 {dimension_numbers = #tpu.dot_dimension_numbers<[1], [0], [0], [1], [0, 0, 1, 1], [], []>} : vector<16x32xbf16>, vector<32x128xbf16>, vector<16x128xf32> -> vector<16x128xf32>
    %84 = arith.addf %59, %83 : vector<16x128xf32>
    %85 = vector.extract_strided_slice %7 {offsets = [0, 96], sizes = [16, 32], strides = [1, 1]} : vector<16x384xf32> to vector<16x32xf32>
    %cst_27 = arith.constant 0.176776692 : f32
    %86 = vector.broadcast %cst_27 : f32 to vector<16x32xf32>
    %87 = arith.mulf %85, %86 : vector<16x32xf32>
    %88 = vector.extract_strided_slice %7 {offsets = [0, 224], sizes = [16, 32], strides = [1, 1]} : vector<16x384xf32> to vector<16x32xf32>
    %89 = vector.extract_strided_slice %7 {offsets = [0, 352], sizes = [16, 32], strides = [1, 1]} : vector<16x384xf32> to vector<16x32xf32>
    %90 = arith.truncf %87 : vector<16x32xf32> to vector<16x32xbf16>
    %91 = arith.truncf %88 : vector<16x32xf32> to vector<16x32xbf16>
    %cst_28 = arith.constant dense<0.000000e+00> : vector<16x16xf32>
    %92 = tpu.matmul %90, %91, %cst_28 {dimension_numbers = #tpu.dot_dimension_numbers<[1], [1], [0], [0], [0, 0, 1, 0], [], []>} : vector<16x32xbf16>, vector<16x32xbf16>, vector<16x16xf32> -> vector<16x16xf32>
    %cst_29 = arith.constant dense<0xFF800000> : vector<16xf32>
    %93 = vector.multi_reduction <maximumf>, %92, %cst_29 [1] : vector<16x16xf32> to vector<16xf32>
    %94 = vector.shape_cast %93 : vector<16xf32> to vector<16x1xf32>
    %95 = vector.broadcast %94 : vector<16x1xf32> to vector<16x16xf32>
    %96 = arith.subf %92, %95 : vector<16x16xf32>
    %97 = math.exp %96 : vector<16x16xf32>
    %cst_30 = arith.constant dense<0.000000e+00> : vector<16xf32>
    %98 = vector.multi_reduction <add>, %97, %cst_30 [1] : vector<16x16xf32> to vector<16xf32>
    %99 = vector.shape_cast %98 : vector<16xf32> to vector<16x1xf32>
    %100 = tpu.reciprocal %99 {approx = true} : vector<16x1xf32> -> vector<16x1xf32>
    %101 = vector.broadcast %100 : vector<16x1xf32> to vector<16x16xf32>
    %102 = arith.mulf %97, %101 : vector<16x16xf32>
    %103 = arith.truncf %102 : vector<16x16xf32> to vector<16x16xbf16>
    %104 = arith.truncf %89 : vector<16x32xf32> to vector<16x32xbf16>
    %cst_31 = arith.constant dense<0.000000e+00> : vector<16x32xf32>
    %105 = tpu.matmul %103, %104, %cst_31 {dimension_numbers = #tpu.dot_dimension_numbers<[1], [0], [0], [1], [0, 0, 1, 1], [], []>} : vector<16x16xbf16>, vector<16x32xbf16>, vector<16x32xf32> -> vector<16x32xf32>
    %106 = arith.truncf %105 : vector<16x32xf32> to vector<16x32xbf16>
    %107 = vector.extract_strided_slice %8 {offsets = [96, 0], sizes = [32, 128], strides = [1, 1]} : vector<128x128xbf16> to vector<32x128xbf16>
    %cst_32 = arith.constant dense<0.000000e+00> : vector<16x128xf32>
    %108 = tpu.matmul %106, %107, %cst_32 {dimension_numbers = #tpu.dot_dimension_numbers<[1], [0], [0], [1], [0, 0, 1, 1], [], []>} : vector<16x32xbf16>, vector<32x128xbf16>, vector<16x128xf32> -> vector<16x128xf32>
    %109 = arith.addf %84, %108 : vector<16x128xf32>
    %c0_33 = arith.constant 0 : index
    %c0_34 = arith.constant 0 : index
    %110 = vector.load %arg5[%c0_33, %c0_34] : memref<1x128xf32, #tpu.memory_space<vmem>>, vector<1x128xf32>
    %111 = vector.broadcast %110 : vector<1x128xf32> to vector<16x128xf32>
    %112 = arith.addf %109, %111 : vector<16x128xf32>
    %113 = arith.addf %112, %1 : vector<16x128xf32>
    %cst_35 = arith.constant dense<0.000000e+00> : vector<16xf32>
    %114 = vector.multi_reduction <add>, %113, %cst_35 [1] : vector<16x128xf32> to vector<16xf32>
    %115 = vector.shape_cast %114 : vector<16xf32> to vector<16x1xf32>
    %cst_36 = arith.constant 1.280000e+02 : f32
    %116 = vector.broadcast %cst_36 : f32 to vector<16x1xf32>
    %117 = arith.divf %115, %116 : vector<16x1xf32>
    %118 = vector.broadcast %117 : vector<16x1xf32> to vector<16x128xf32>
    %119 = arith.subf %113, %118 : vector<16x128xf32>
    %120 = arith.mulf %119, %119 : vector<16x128xf32>
    %cst_37 = arith.constant dense<0.000000e+00> : vector<16xf32>
    %121 = vector.multi_reduction <add>, %120, %cst_37 [1] : vector<16x128xf32> to vector<16xf32>
    %122 = vector.shape_cast %121 : vector<16xf32> to vector<16x1xf32>
    %cst_38 = arith.constant 1.280000e+02 : f32
    %123 = vector.broadcast %cst_38 : f32 to vector<16x1xf32>
    %124 = arith.divf %122, %123 : vector<16x1xf32>
    %125 = vector.broadcast %117 : vector<16x1xf32> to vector<16x128xf32>
    %126 = arith.subf %113, %125 : vector<16x128xf32>
    %cst_39 = arith.constant 9.99999974E-6 : f32
    %127 = vector.broadcast %cst_39 : f32 to vector<16x1xf32>
    %128 = arith.addf %124, %127 : vector<16x1xf32>
    %129 = math.rsqrt %128 : vector<16x1xf32>
    %130 = vector.broadcast %129 : vector<16x1xf32> to vector<16x128xf32>
    %131 = arith.mulf %126, %130 : vector<16x128xf32>
    %c0_40 = arith.constant 0 : index
    %c0_41 = arith.constant 0 : index
    %132 = vector.load %arg6[%c0_40, %c0_41] : memref<1x128xf32, #tpu.memory_space<vmem>>, vector<1x128xf32>
    %133 = vector.broadcast %132 : vector<1x128xf32> to vector<16x128xf32>
    %134 = arith.mulf %131, %133 : vector<16x128xf32>
    %c0_42 = arith.constant 0 : index
    %c0_43 = arith.constant 0 : index
    %135 = vector.load %arg7[%c0_42, %c0_43] : memref<1x128xf32, #tpu.memory_space<vmem>>, vector<1x128xf32>
    %136 = vector.broadcast %135 : vector<1x128xf32> to vector<16x128xf32>
    %137 = arith.addf %134, %136 : vector<16x128xf32>
    %c0_44 = arith.constant 0 : index
    %c0_45 = arith.constant 0 : index
    %c0_46 = arith.constant 0 : index
    %138 = vector.load %arg8[%c0_44, %c0_45, %c0_46] : memref<1x16x128xf32, #tpu.memory_space<vmem>>, vector<1x16x128xf32>
    %139 = vector.shape_cast %138 : vector<1x16x128xf32> to vector<16x128xf32>
    %140 = vector.shape_cast %137 : vector<16x128xf32> to vector<1x16x128xf32>
    tpu.vector_store %arg8[%c0_44, %c0_45, %c0_46], %140 {strides = array<i32>} : memref<1x16x128xf32, #tpu.memory_space<vmem>>, vector<1x16x128xf32>,
    return
  }
  func.func @transform_0(%arg0: i32) -> (i32, i32, i32) {
    %c0_i32 = arith.constant 0 : i32
    %c0_i32_0 = arith.constant 0 : i32
    %c0_i32_1 = arith.constant 0 : i32
    return %arg0, %c0_i32, %c0_i32_0 : i32, i32, i32
  }
  func.func @transform_1(%arg0: i32) -> (i32, i32) {
    %c0_i32 = arith.constant 0 : i32
    %c0_i32_0 = arith.constant 0 : i32
    %c0_i32_1 = arith.constant 0 : i32
    return %c0_i32, %c0_i32_0 : i32, i32
  }
  func.func @transform_2(%arg0: i32) -> (i32, i32) {
    %c0_i32 = arith.constant 0 : i32
    %c0_i32_0 = arith.constant 0 : i32
    %c0_i32_1 = arith.constant 0 : i32
    return %c0_i32, %c0_i32_0 : i32, i32
  }
  func.func @transform_3(%arg0: i32) -> (i32, i32) {
    %c0_i32 = arith.constant 0 : i32
    %c0_i32_0 = arith.constant 0 : i32
    %c0_i32_1 = arith.constant 0 : i32
    return %c0_i32, %c0_i32_0 : i32, i32
  }
  func.func @transform_4(%arg0: i32) -> (i32, i32) {
    %c0_i32 = arith.constant 0 : i32
    %c0_i32_0 = arith.constant 0 : i32
    %c0_i32_1 = arith.constant 0 : i32
    return %c0_i32, %c0_i32_0 : i32, i32
  }
  func.func @transform_5(%arg0: i32) -> (i32, i32) {
    %c0_i32 = arith.constant 0 : i32
    %c0_i32_0 = arith.constant 0 : i32
    %c0_i32_1 = arith.constant 0 : i32
    return %c0_i32, %c0_i32_0 : i32, i32
  }
  func.func @transform_6(%arg0: i32) -> (i32, i32) {
    %c0_i32 = arith.constant 0 : i32
    %c0_i32_0 = arith.constant 0 : i32
    %c0_i32_1 = arith.constant 0 : i32
    return %c0_i32, %c0_i32_0 : i32, i32
  }
  func.func @transform_7(%arg0: i32) -> (i32, i32, i32) {
    %c0_i32 = arith.constant 0 : i32
    %c0_i32_0 = arith.constant 0 : i32
    %c0_i32_1 = arith.constant 0 : i32
    return %arg0, %c0_i32, %c0_i32_0 : i32, i32, i32
  }
}

module attributes {stable_mosaic.version = 11 : i64} {
  func.func @_layernorm_kernel(%arg0: i32, %arg1: memref<32x128xf32, #tpu.memory_space<vmem>>, %arg2: memref<1x128xf32, #tpu.memory_space<vmem>>, %arg3: memref<1x128xf32, #tpu.memory_space<vmem>>, %arg4: memref<32x128xf32, #tpu.memory_space<vmem>>) attributes {dimension_semantics = [#tpu.dimension_semantics<parallel>], iteration_bounds = array<i64: 1>, scalar_prefetch = 0 : i64, scratch_operands = 0 : i64, tpu.core_type = #tpu.core_type<tc>, window_params = [{transform_indices = @transform_0, window_bounds = array<i64: 32, 128>}, {pipeline_mode = #tpu.pipeline_mode<synchronous>, transform_indices = @transform_1, window_bounds = array<i64: 1, 128>}, {pipeline_mode = #tpu.pipeline_mode<synchronous>, transform_indices = @transform_2, window_bounds = array<i64: 1, 128>}, {transform_indices = @transform_3, window_bounds = array<i64: 32, 128>}]} {
    %c0 = arith.constant 0 : index
    %c0_0 = arith.constant 0 : index
    %0 = vector.load %arg1[%c0, %c0_0] : memref<32x128xf32, #tpu.memory_space<vmem>>, vector<32x128xf32>
    %cst = arith.constant dense<0.000000e+00> : vector<32xf32>
    %1 = vector.multi_reduction <add>, %0, %cst [1] : vector<32x128xf32> to vector<32xf32>
    %2 = vector.shape_cast %1 : vector<32xf32> to vector<32x1xf32>
    %cst_1 = arith.constant 1.280000e+02 : f32
    %3 = vector.broadcast %cst_1 : f32 to vector<32x1xf32>
    %4 = arith.divf %2, %3 : vector<32x1xf32>
    %5 = vector.broadcast %4 : vector<32x1xf32> to vector<32x128xf32>
    %6 = arith.subf %0, %5 : vector<32x128xf32>
    %7 = arith.mulf %6, %6 : vector<32x128xf32>
    %cst_2 = arith.constant dense<0.000000e+00> : vector<32xf32>
    %8 = vector.multi_reduction <add>, %7, %cst_2 [1] : vector<32x128xf32> to vector<32xf32>
    %9 = vector.shape_cast %8 : vector<32xf32> to vector<32x1xf32>
    %cst_3 = arith.constant 1.280000e+02 : f32
    %10 = vector.broadcast %cst_3 : f32 to vector<32x1xf32>
    %11 = arith.divf %9, %10 : vector<32x1xf32>
    %12 = vector.broadcast %4 : vector<32x1xf32> to vector<32x128xf32>
    %13 = arith.subf %0, %12 : vector<32x128xf32>
    %cst_4 = arith.constant 9.99999974E-6 : f32
    %14 = vector.broadcast %cst_4 : f32 to vector<32x1xf32>
    %15 = arith.addf %11, %14 : vector<32x1xf32>
    %16 = math.rsqrt %15 : vector<32x1xf32>
    %17 = vector.broadcast %16 : vector<32x1xf32> to vector<32x128xf32>
    %18 = arith.mulf %13, %17 : vector<32x128xf32>
    %c0_5 = arith.constant 0 : index
    %c0_6 = arith.constant 0 : index
    %19 = vector.load %arg2[%c0_5, %c0_6] : memref<1x128xf32, #tpu.memory_space<vmem>>, vector<1x128xf32>
    %20 = vector.broadcast %19 : vector<1x128xf32> to vector<32x128xf32>
    %21 = arith.mulf %18, %20 : vector<32x128xf32>
    %c0_7 = arith.constant 0 : index
    %c0_8 = arith.constant 0 : index
    %22 = vector.load %arg3[%c0_7, %c0_8] : memref<1x128xf32, #tpu.memory_space<vmem>>, vector<1x128xf32>
    %23 = vector.broadcast %22 : vector<1x128xf32> to vector<32x128xf32>
    %24 = arith.addf %21, %23 : vector<32x128xf32>
    %c0_9 = arith.constant 0 : index
    %c0_10 = arith.constant 0 : index
    %25 = vector.load %arg4[%c0_9, %c0_10] : memref<32x128xf32, #tpu.memory_space<vmem>>, vector<32x128xf32>
    tpu.vector_store %arg4[%c0_9, %c0_10], %24 {strides = array<i32>} : memref<32x128xf32, #tpu.memory_space<vmem>>, vector<32x128xf32>,
    return
  }
  func.func @transform_0(%arg0: i32) -> (i32, i32) {
    %c0_i32 = arith.constant 0 : i32
    %c0_i32_0 = arith.constant 0 : i32
    return %arg0, %c0_i32 : i32, i32
  }
  func.func @transform_1(%arg0: i32) -> (i32, i32) {
    %c0_i32 = arith.constant 0 : i32
    %c0_i32_0 = arith.constant 0 : i32
    %c0_i32_1 = arith.constant 0 : i32
    return %c0_i32, %c0_i32_0 : i32, i32
  }
  func.func @transform_2(%arg0: i32) -> (i32, i32) {
    %c0_i32 = arith.constant 0 : i32
    %c0_i32_0 = arith.constant 0 : i32
    %c0_i32_1 = arith.constant 0 : i32
    return %c0_i32, %c0_i32_0 : i32, i32
  }
  func.func @transform_3(%arg0: i32) -> (i32, i32) {
    %c0_i32 = arith.constant 0 : i32
    %c0_i32_0 = arith.constant 0 : i32
    return %arg0, %c0_i32 : i32, i32
  }
}

module attributes {stable_mosaic.version = 11 : i64} {
  func.func @_matmul_bias_kernel(%arg0: i32, %arg1: i32, %arg2: i32, %arg3: memref<32x128xbf16, #tpu.memory_space<vmem>>, %arg4: memref<128x256xbf16, #tpu.memory_space<vmem>>, %arg5: memref<1x256xf32, #tpu.memory_space<vmem>>, %arg6: memref<32x256xf32, #tpu.memory_space<vmem>>, %arg7: memref<32x256xf32, #tpu.memory_space<vmem>>) attributes {dimension_semantics = [#tpu.dimension_semantics<parallel>, #tpu.dimension_semantics<parallel>, #tpu.dimension_semantics<arbitrary>], iteration_bounds = array<i64: 1, 1, 1>, scalar_prefetch = 0 : i64, scratch_operands = 1 : i64, tpu.core_type = #tpu.core_type<tc>, window_params = [{transform_indices = @transform_0, window_bounds = array<i64: 32, 128>}, {transform_indices = @transform_1, window_bounds = array<i64: 128, 256>}, {transform_indices = @transform_2, window_bounds = array<i64: 1, 256>}, {transform_indices = @transform_3, window_bounds = array<i64: 32, 256>}]} {
    %c0_i32 = arith.constant 0 : i32
    %0 = arith.cmpi eq, %arg2, %c0_i32 : i32
    %1 = arith.extui %0 : i1 to i32
    %c0_i32_0 = arith.constant 0 : i32
    %2 = arith.cmpi ne, %1, %c0_i32_0 : i32
    scf.if %2 {
      %cst_10 = arith.constant 0.000000e+00 : f32
      %12 = vector.broadcast %cst_10 : f32 to vector<32x256xf32>
      %c0_11 = arith.constant 0 : index
      %c0_12 = arith.constant 0 : index
      %13 = vector.load %arg7[%c0_11, %c0_12] : memref<32x256xf32, #tpu.memory_space<vmem>>, vector<32x256xf32>
      tpu.vector_store %arg7[%c0_11, %c0_12], %12 {strides = array<i32>} : memref<32x256xf32, #tpu.memory_space<vmem>>, vector<32x256xf32>,
    } else {
    }
    %c0 = arith.constant 0 : index
    %c0_1 = arith.constant 0 : index
    %3 = vector.load %arg7[%c0, %c0_1] : memref<32x256xf32, #tpu.memory_space<vmem>>, vector<32x256xf32>
    %c0_2 = arith.constant 0 : index
    %c0_3 = arith.constant 0 : index
    %4 = vector.load %arg3[%c0_2, %c0_3] : memref<32x128xbf16, #tpu.memory_space<vmem>>, vector<32x128xbf16>
    %c0_4 = arith.constant 0 : index
    %c0_5 = arith.constant 0 : index
    %5 = vector.load %arg4[%c0_4, %c0_5] : memref<128x256xbf16, #tpu.memory_space<vmem>>, vector<128x256xbf16>
    %cst = arith.constant dense<0.000000e+00> : vector<32x256xf32>
    %6 = tpu.matmul %4, %5, %cst {dimension_numbers = #tpu.dot_dimension_numbers<[1], [0], [0], [1], [0, 0, 1, 1], [], []>} : vector<32x128xbf16>, vector<128x256xbf16>, vector<32x256xf32> -> vector<32x256xf32>
    %7 = arith.addf %3, %6 : vector<32x256xf32>
    %c0_6 = arith.constant 0 : index
    %c0_7 = arith.constant 0 : index
    %8 = vector.load %arg7[%c0_6, %c0_7] : memref<32x256xf32, #tpu.memory_space<vmem>>, vector<32x256xf32>
    tpu.vector_store %arg7[%c0_6, %c0_7], %7 {strides = array<i32>} : memref<32x256xf32, #tpu.memory_space<vmem>>, vector<32x256xf32>,
    %c0_i32_8 = arith.constant 0 : i32
    %9 = arith.cmpi eq, %arg2, %c0_i32_8 : i32
    %10 = arith.extui %9 : i1 to i32
    %c0_i32_9 = arith.constant 0 : i32
    %11 = arith.cmpi ne, %10, %c0_i32_9 : i32
    scf.if %11 {
      %c0_10 = arith.constant 0 : index
      %c0_11 = arith.constant 0 : index
      %12 = vector.load %arg7[%c0_10, %c0_11] : memref<32x256xf32, #tpu.memory_space<vmem>>, vector<32x256xf32>
      %c0_12 = arith.constant 0 : index
      %c0_13 = arith.constant 0 : index
      %13 = vector.load %arg5[%c0_12, %c0_13] : memref<1x256xf32, #tpu.memory_space<vmem>>, vector<1x256xf32>
      %14 = vector.broadcast %13 : vector<1x256xf32> to vector<32x256xf32>
      %15 = arith.addf %12, %14 : vector<32x256xf32>
      %c0_14 = arith.constant 0 : index
      %c0_15 = arith.constant 0 : index
      %16 = vector.load %arg6[%c0_14, %c0_15] : memref<32x256xf32, #tpu.memory_space<vmem>>, vector<32x256xf32>
      tpu.vector_store %arg6[%c0_14, %c0_15], %15 {strides = array<i32>} : memref<32x256xf32, #tpu.memory_space<vmem>>, vector<32x256xf32>,
    } else {
    }
    return
  }
  func.func @transform_0(%arg0: i32, %arg1: i32, %arg2: i32) -> (i32, i32) {
    %c0_i32 = arith.constant 0 : i32
    return %arg0, %arg2 : i32, i32
  }
  func.func @transform_1(%arg0: i32, %arg1: i32, %arg2: i32) -> (i32, i32) {
    %c0_i32 = arith.constant 0 : i32
    return %arg2, %arg1 : i32, i32
  }
  func.func @transform_2(%arg0: i32, %arg1: i32, %arg2: i32) -> (i32, i32) {
    %c0_i32 = arith.constant 0 : i32
    %c0_i32_0 = arith.constant 0 : i32
    return %c0_i32, %arg1 : i32, i32
  }
  func.func @transform_3(%arg0: i32, %arg1: i32, %arg2: i32) -> (i32, i32) {
    %c0_i32 = arith.constant 0 : i32
    return %arg0, %arg1 : i32, i32
  }
}

</mosaic_0001>

<bundles_post_ra>
// kernel: gpt_forward.10
= control target key start
LH: loop header
LB: loop body
LE: loop exit
PB: predicated region body
PF: predicated region fallthrough
CT: control target
= control target key end

     0   :  { %s153_s0 = inlined_call_operand.vmem [shape: f32[32,128], index: 0, kind: input, shape index: {}]   ;;  %s154_s1 = inlined_call_operand.vmem [shape: f32[1,128], index: 1, kind: input, shape index: {}]   ;;  %s155_s2 = inlined_call_operand.vmem [shape: f32[1,128], index: 2, kind: input, shape index: {}]   ;;  %s156_s3 = inlined_call_operand.vmem [shape: f32[32,128], index: 3, kind: output, shape index: {}]  }
   0x1   :  { %v14_v0 = vld [vmem:[%s153_s0] sm:$0xff]  ;;  %v16_v1 = vld [vmem:[%s153_s0 + $0x10] sm:$0xff]  ;;  %v15_v2 = vld [vmem:[%s153_s0 + $0x8] sm:$0xff] }
   0x2   :  { %18 = vadd.xlane.f32.xlu0 %v14_v0  ;;  %22 = vadd.xlane.f32.xlu1 %v16_v1  ;;  %v17_v3 = vld [vmem:[%s153_s0 + $0x18] sm:$0xff]  ;;  %v93_v33 = vld [vmem:[%s154_s1] ss:$0 sm:$0xff] }
   0x3   :  { %v94_v35 = vld [vmem:[%s155_s2] ss:$0 sm:$0xff] }
   0x6   :  { %20 = vadd.xlane.f32.xlu0 %v15_v2  ;;  %24 = vadd.xlane.f32.xlu1 %v17_v3 }
  0x8f   :  { %v19_v4 = vpop.xlane.xlu0 %18  ;;  %v23_v5 = vpop.xlane.xlu1 %22 }
  0x90   :  { %v27_v6 = vmul.f32 0.0078125, %v19_v4  ;;  %v29_v7 = vmul.f32 0.0078125, %v23_v5 }
  0x92   :  { %v31_v8 = vsub.f32 %v14_v0, %v27_v6  ;;  %v33_v9 = vsub.f32 %v16_v1, %v29_v7 }
  0x93   :  { %v21_v10 = vpop.xlane.xlu0 %20  ;;  %v25_v11 = vpop.xlane.xlu1 %24 }
  0x94   :  { %v28_v12 = vmul.f32 0.0078125, %v21_v10  ;;  %v35_v13 = vmul.f32 %v31_v8, %v31_v8  ;;  %v30_v14 = vmul.f32 0.0078125, %v25_v11  ;;  %v37_v17 = vmul.f32 %v33_v9, %v33_v9 }
  0x96   :  { %v32_v15 = vsub.f32 %v15_v2, %v28_v12  ;;  %39 = vadd.xlane.f32.xlu0 %v35_v13  ;;  %v34_v16 = vsub.f32 %v17_v3, %v30_v14 }
  0x98   :  { %v36_v18 = vmul.f32 %v32_v15, %v32_v15  ;;  %v38_v19 = vmul.f32 %v34_v16, %v34_v16 }
  0x9a   :  { %43 = vadd.xlane.f32.xlu0 %v37_v17  ;;  %41 = vadd.xlane.f32.xlu1 %v36_v18 }
  0x9e   :  { %45 = vadd.xlane.f32.xlu1 %v38_v19 }
 0x123   :  { %v40_v20 = vpop.xlane.xlu0 %39 }
 0x124   :  { %v47_v21 = vmul.f32 0.0078125, %v40_v20 }
 0x126   :  { %v51_v22 = vadd.f32 1e-05, %v47_v21 }
 0x127   :  { %v42_v23 = vpop.xlane.xlu1 %41  ;;  %v44_v24 = vpop.xlane.xlu0 %43 }
 0x128   :  { %95 = vrsqrt.f32 %v51_v22  ;;  %v48_v25 = vmul.f32 0.0078125, %v42_v23  ;;  %v49_v26 = vmul.f32 0.0078125, %v44_v24 }
 0x12a   :  { %v52_v27 = vadd.f32 1e-05, %v48_v25  ;;  %v53_v28 = vadd.f32 1e-05, %v49_v26 }
 0x12b   :  { %v46_v29 = vpop.xlane.xlu1 %45 }
 0x12c   :  { %97 = vrsqrt.f32 %v52_v27  ;;  %v50_v30 = vmul.f32 0.0078125, %v46_v29 }
 0x12d   :  { %99 = vrsqrt.f32 %v53_v28 }
 0x12e   :  { %v54_v31 = vadd.f32 1e-05, %v50_v30 }
 0x130   :  { %101 = vrsqrt.f32 %v54_v31 }
 0x132   :  { %v96_v32 = vpop.eup %95 }
 0x133   :  { %v59_v34 = vmul.f32 %v96_v32, %v31_v8 }
 0x135   :  { %v70_v36 = vmul.f32 %v93_v33, %v59_v34 }
 0x136   :  { %v98_v37 = vpop.eup %97 }
 0x137   :  { %v100_v38 = vpop.eup %99  ;;  %v81_v39 = vadd.f32 %v94_v35, %v70_v36  ;;  %v60_v40 = vmul.f32 %v98_v37, %v32_v15 }
 0x138   :  { %v61_v41 = vmul.f32 %v100_v38, %v33_v9 }
 0x139   :  { %85 = vst [vmem:[%s156_s3] sm:$0xff] %v81_v39  ;;  %v71_v42 = vmul.f32 %v93_v33, %v60_v40 }
 0x13a   :  { %v102_v43 = vpop.eup %101  ;;  %v72_v44 = vmul.f32 %v93_v33, %v61_v41 }
 0x13b   :  { %v82_v45 = vadd.f32 %v94_v35, %v71_v42  ;;  %v62_v46 = vmul.f32 %v102_v43, %v34_v16 }
 0x13c   :  { %v83_v47 = vadd.f32 %v94_v35, %v72_v44 }
 0x13d   :  { %86 = vst [vmem:[%s156_s3 + $0x8] sm:$0xff] %v82_v45  ;;  %v73_v48 = vmul.f32 %v93_v33, %v62_v46 }
 0x13e   :  { %87 = vst [vmem:[%s156_s3 + $0x10] sm:$0xff] %v83_v47 }
 0x13f   :  { %v84_v49 = vadd.f32 %v94_v35, %v73_v48 }
 0x141   :  { %88 = vst [vmem:[%s156_s3 + $0x18] sm:$0xff] %v84_v49 }

// kernel: gpt_forward.7
= control target key start
LH: loop header
LB: loop body
LE: loop exit
PB: predicated region body
PF: predicated region fallthrough
CT: control target
= control target key end

     0   :  { %v581_v1 = vmov 0   ;;  %v51_v39 = vlaneseq  ;;  %s770_s1 = inlined_call_operand.vmem [shape: bf16[128,256], index: 1, kind: input, shape index: {}]   ;;  %s771_s3 = inlined_call_operand.vmem [shape: bf16[256,128], index: 3, kind: input, shape index: {}]   ;;  %s772_s0 = inlined_call_operand.vmem [shape: f32[32,128], index: 0, kind: input, shape index: {}]   ;;  %s773_s2 = inlined_call_operand.vmem [shape: f32[1,256], index: 2, kind: input, shape index: {}]   ;;  %s774_s4 = inlined_call_operand.vmem [shape: f32[1,128], index: 4, kind: input, shape index: {}]   ;;  %s775_s5 = inlined_call_operand.vmem [shape: f32[1,128], index: 5, kind: input, shape index: {}]   ;;  %s776_s6 = inlined_call_operand.vmem [shape: f32[1,128], index: 6, kind: input, shape index: {}]   ;;  %s777_s7 = inlined_call_operand.vmem [shape: f32[32,128], index: 7, kind: output, shape index: {}]  }
   0x1   :  { %v533_v0 = vld [vmem:[%s770_s1 + $0x4] ss:$8 sps:$4 sm:$0xff]   ;;  %173 = vmatprep.mubr.bf16.mxu0 %v581_v1  ;;  %v535_v2 = vld [vmem:[%s770_s1] ss:$8 sps:$4 sm:$0xff]   ;;  %v536_v3 = vld [vmem:[%s770_s1 + $0x14] ss:$8 sps:$4 sm:$0xff]  }
   0x2   :  { %141 = vmatprep.subr.bf16.mxu0 %v533_v0  ;;  %v538_v4 = vld [vmem:[%s770_s1 + $0x10] ss:$8 sps:$4 sm:$0xff]   ;;  %v539_v5 = vld [vmem:[%s770_s1 + $0x24] ss:$8 sps:$4 sm:$0xff]   ;;  %v541_v6 = vld [vmem:[%s770_s1 + $0x20] ss:$8 sps:$4 sm:$0xff]  }
   0x3   :  { %142 = vmatpush1.bf16.msra.mxu0 %v535_v2  ;;  %v542_v7 = vld [vmem:[%s770_s1 + $0x34] ss:$8 sps:$4 sm:$0xff]   ;;  %v544_v8 = vld [vmem:[%s770_s1 + $0x30] ss:$8 sps:$4 sm:$0xff]   ;;  %v545_v9 = vld [vmem:[%s770_s1 + $0x44] ss:$8 sps:$4 sm:$0xff]  }
   0x4   :  { %143 = vmatprep.subr.bf16.mxu0 %v536_v3  ;;  %v557_v10 = vld [vmem:[%s771_s3 + $0x40] sm:$0xff]   ;;  %v548_v13 = vld [vmem:[%s770_s1 + $0x54] ss:$8 sps:$4 sm:$0xff]   ;;  %v559_v14 = vld [vmem:[%s771_s3 + $0x48] sm:$0xff]   ;;  %v52_v40 = vshrl.u32 %v51_v39, 7 }
   0x5   :  { %v547_v11 = vld [vmem:[%s770_s1 + $0x40] ss:$8 sps:$4 sm:$0xff]   ;;  %504 = vmatprep.subr.bf16.mxu1 %v557_v10  ;;  %v561_v16 = vld [vmem:[%s771_s3 + $0x50] sm:$0xff]   ;;  %v551_v18 = vld [vmem:[%s770_s1 + $0x64] ss:$8 sps:$4 sm:$0xff]  }
   0x6   :  { %v558_v12 = vld [vmem:[%s771_s3] sm:$0xff]   ;;  %v560_v15 = vld [vmem:[%s771_s3 + $0x8] sm:$0xff]   ;;  %v550_v17 = vld [vmem:[%s770_s1 + $0x50] ss:$8 sps:$4 sm:$0xff]   ;;  %v53_v41 = vsub.s32 0, %v52_v40  ;;  %v57_v43 = vsub.s32 1, %v52_v40 }
   0x7   :  { %144 = vmatpush1.bf16.msra.mxu0 %v538_v4  ;;  %505 = vmatpush3.bf16.msra.mxu1 %v558_v12  ;;  %v562_v19 = vld [vmem:[%s771_s3 + $0x10] sm:$0xff]   ;;  %v563_v20 = vld [vmem:[%s771_s3 + $0x58] sm:$0xff]   ;;  %v553_v21 = vld [vmem:[%s770_s1 + $0x60] ss:$8 sps:$4 sm:$0xff]  }
   0x8   :  { %145 = vmatprep.subr.bf16.mxu0 %v539_v5  ;;  %506 = vmatprep.subr.bf16.mxu1 %v559_v14  ;;  %v554_v22 = vld [vmem:[%s770_s1 + $0x74] ss:$8 sps:$4 sm:$0xff]   ;;  %v565_v24 = vld [vmem:[%s771_s3 + $0x60] sm:$0xff]   ;;  %v556_v25 = vld [vmem:[%s770_s1 + $0x70] ss:$8 sps:$4 sm:$0xff]  }
   0x9   :  { %v564_v23 = vld [vmem:[%s771_s3 + $0x18] sm:$0xff]   ;;  %v700_v26 = vld [vmem:[%s772_s0] sm:$0xff]  ;;  %v705_v27 = vld [vmem:[%s772_s0 + $0x8] sm:$0xff] }
   0xa   :  { %v566_v28 = vld [vmem:[%s771_s3 + $0x20] sm:$0xff]   ;;  %v567_v29 = vld [vmem:[%s771_s3 + $0x68] sm:$0xff]   ;;  %v31_v30 = vpack.c.bf16 %v705_v27, %v700_v26  ;;  %v718_v31 = vld [vmem:[%s772_s0 + $0x10] sm:$0xff] }
   0xb   :  { %146 = vmatpush1.bf16.msra.mxu0 %v541_v6  ;;  %507 = vmatpush3.bf16.msra.mxu1 %v560_v15  ;;  %v723_v32 = vld [vmem:[%s772_s0 + $0x18] sm:$0xff]  ;;  %v568_v34 = vld [vmem:[%s771_s3 + $0x28] sm:$0xff]   ;;  %v569_v35 = vld [vmem:[%s771_s3 + $0x70] sm:$0xff]  }
   0xc   :  { %147 = vmatprep.subr.bf16.mxu0 %v542_v7  ;;  %508 = vmatprep.subr.bf16.mxu1 %v561_v16  ;;  %v32_v33 = vpack.c.bf16 %v723_v32, %v718_v31  ;;  %v570_v36 = vld [vmem:[%s771_s3 + $0x30] sm:$0xff]   ;;  %v571_v37 = vld [vmem:[%s771_s3 + $0x78] sm:$0xff]   ;;  %v49_v42 = vld [vmem:[%s773_s2] sm:$0x3] }
   0xd   :  { %v572_v38 = vld [vmem:[%s771_s3 + $0x38] sm:$0xff]   ;;  %v54_v44 = vrot.slane %v49_v42, %v53_v41  ;;  %v58_v45 = vrot.slane %v49_v42, %v57_v43 }
   0xf   :  { %148 = vmatpush1.bf16.msra.mxu0 %v544_v8  ;;  %509 = vmatpush3.bf16.msra.mxu1 %v562_v19 }
  0x10   :  { %149 = vmatprep.subr.bf16.mxu0 %v545_v9  ;;  %510 = vmatprep.subr.bf16.mxu1 %v563_v20 }
  0x13   :  { %150 = vmatpush1.bf16.msra.mxu0 %v547_v11  ;;  %511 = vmatpush3.bf16.msra.mxu1 %v564_v23  ;;  %v485_v11 = vld [vmem:[%s774_s4] ss:$0 sm:$0xff] }
  0x14   :  { %151 = vmatprep.subr.bf16.mxu0 %v548_v13  ;;  %512 = vmatprep.subr.bf16.mxu1 %v565_v24 }
  0x17   :  { %152 = vmatpush1.bf16.msra.mxu0 %v550_v17  ;;  %513 = vmatpush3.bf16.msra.mxu1 %v566_v28 }
  0x18   :  { %153 = vmatprep.subr.bf16.mxu0 %v551_v18  ;;  %514 = vmatprep.subr.bf16.mxu1 %v567_v29 }
  0x1b   :  { %154 = vmatpush1.bf16.msra.mxu0 %v553_v21  ;;  %515 = vmatpush3.bf16.msra.mxu1 %v568_v34 }
  0x1c   :  { %155 = vmatprep.subr.bf16.mxu0 %v554_v22  ;;  %516 = vmatprep.subr.bf16.mxu1 %v569_v35 }
  0x1f   :  { %156 = vmatpush1.bf16.msra.mxu0 %v556_v25  ;;  %517 = vmatpush3.bf16.msra.mxu1 %v570_v36 }
  0x20   :  { %518 = vmatprep.subr.bf16.mxu1 %v571_v37 }
  0x22   :  { %174 = vmatmul.mubr.bf16.vlgmr.msra.gmra.mrb[0].mxu0 %v31_v30 }
  0x23   :  { %183 = vmatprep.mubr.bf16.mxu0 %v581_v1  ;;  %519 = vmatpush3.bf16.msra.mxu1 %v572_v38 }
  0x2a   :  { %184 = vmatmul.mubr.bf16.gmra.mrb[4].mxu0 %v32_v33 }
  0xf5   :  { %v175_v46 = vpop.f32.mrb[0].mxu0 }
  0xf6   :  { %v176_v47 = vadd.f32 %v175_v46, %v54_v44  ;;  %v177_v48 = vpop.f32.mrb[1].mxu0 }
  0xf7   :  { %v178_v49 = vadd.f32 %v177_v48, %v58_v45  ;;  %v179_v50 = vpop.f32.mrb[2].mxu0 }
  0xf8   :  { %v180_v51 = vadd.f32 %v179_v50, %v54_v44  ;;  %v181_v52 = vpop.f32.mrb[3].mxu0  ;;  %v194_v54 = vmax.f32 %v176_v47, 0.0 }
  0xf9   :  { %v182_v53 = vadd.f32 %v181_v52, %v58_v45  ;;  %v195_v56 = vmax.f32 %v178_v49, 0.0 }
  0xfa   :  { %v196_v55 = vmax.f32 %v180_v51, 0.0 }
  0xfb   :  { %v197_v57 = vmax.f32 %v182_v53, 0.0 }
  0xfc   :  { %v202_v58 = vpack.c.bf16 %v196_v55, %v194_v54 }
  0xfd   :  { %v185_v59 = vpop.f32.mrb[4].mxu0  ;;  %v203_v60 = vpack.c.bf16 %v197_v57, %v195_v56 }
  0xfe   :  { %v186_v61 = vadd.f32 %v185_v59, %v54_v44  ;;  %v187_v62 = vpop.f32.mrb[5].mxu0  ;;  %v502_v59 = vld [vmem:[%s775_s5] ss:$0 sm:$0xff] }
  0xff   :  { %v188_v63 = vadd.f32 %v187_v62, %v58_v45  ;;  %v189_v0 = vpop.f32.mrb[6].mxu0  ;;  %373 = vmatprep.mubr.bf16.mxu1 %v203_v60  ;;  %v503_v62 = vld [vmem:[%s776_s6] ss:$0 sm:$0xff] }
 0x100   :  { %v190_v1 = vadd.f32 %v189_v0, %v54_v44  ;;  %v191_v2 = vpop.f32.mrb[7].mxu0  ;;  %374 = vmatmul.mubr.bf16.vlgmr.msra.gmra.mrb[0].mxu1 %v202_v58  ;;  %v198_v4 = vmax.f32 %v186_v61, 0.0 }
 0x101   :  { %v192_v3 = vadd.f32 %v191_v2, %v58_v45  ;;  %v199_v6 = vmax.f32 %v188_v63, 0.0 }
 0x102   :  { %v200_v5 = vmax.f32 %v190_v1, 0.0 }
 0x103   :  { %v201_v7 = vmax.f32 %v192_v3, 0.0 }
 0x104   :  { %v204_v8 = vpack.c.bf16 %v200_v5, %v198_v4 }
 0x105   :  { %v205_v9 = vpack.c.bf16 %v201_v7, %v199_v6 }
 0x107   :  { %381 = vmatprep.mubr.bf16.mxu1 %v205_v9 }
 0x108   :  { %382 = vmatmul.mubr.bf16.gmra.mrb[4].mxu1 %v204_v8 }
 0x1d3   :  { %v520_v10 = vpop.f32.mrb[0].mxu1 }
 0x1d4   :  { %v521_v12 = vpop.f32.mrb[1].mxu1 }
 0x1d5   :  { %v522_v13 = vadd.f32 %v521_v12, %v520_v10  ;;  %v523_v14 = vpop.f32.mrb[2].mxu1 }
 0x1d6   :  { %v524_v15 = vpop.f32.mrb[3].mxu1 }
 0x1d7   :  { %v376_v16 = vadd.f32 %v522_v13, %v485_v11  ;;  %v525_v17 = vadd.f32 %v524_v15, %v523_v14 }
 0x1d9   :  { %v379_v18 = vadd.f32 %v525_v17, %v485_v11  ;;  %v390_v19 = vadd.f32 %v376_v16, %v700_v26 }
 0x1db   :  { %v526_v20 = vpop.f32.mrb[4].mxu1  ;;  %394 = vadd.xlane.f32.xlu0 %v390_v19  ;;  %v391_v24 = vadd.f32 %v379_v18, %v705_v27 }
 0x1dc   :  { %v527_v21 = vpop.f32.mrb[5].mxu1 }
 0x1dd   :  { %v528_v22 = vadd.f32 %v527_v21, %v526_v20  ;;  %v529_v23 = vpop.f32.mrb[6].mxu1 }
 0x1de   :  { %v530_v25 = vpop.f32.mrb[7].mxu1 }
 0x1df   :  { %v384_v28 = vadd.f32 %v528_v22, %v485_v11  ;;  %v531_v29 = vadd.f32 %v530_v25, %v529_v23  ;;  %396 = vadd.xlane.f32.xlu0 %v391_v24 }
 0x1e1   :  { %v387_v30 = vadd.f32 %v531_v29, %v485_v11  ;;  %v392_v33 = vadd.f32 %v384_v28, %v718_v31 }
 0x1e3   :  { %398 = vadd.xlane.f32.xlu1 %v392_v33  ;;  %v393_v34 = vadd.f32 %v387_v30, %v723_v32 }
 0x1e7   :  { %400 = vadd.xlane.f32.xlu1 %v393_v34 }
 0x268   :  { %v395_v35 = vpop.xlane.xlu0 %394 }
 0x269   :  { %v403_v26 = vmul.f32 0.0078125, %v395_v35 }
 0x26b   :  { %v407_v36 = vsub.f32 %v390_v19, %v403_v26 }
 0x26c   :  { %v397_v37 = vpop.xlane.xlu0 %396 }
 0x26d   :  { %v404_v38 = vmul.f32 0.0078125, %v397_v37  ;;  %v411_v39 = vmul.f32 %v407_v36, %v407_v36 }
 0x26f   :  { %v408_v40 = vsub.f32 %v391_v24, %v404_v38  ;;  %415 = vadd.xlane.f32.xlu0 %v411_v39 }
 0x270   :  { %v399_v27 = vpop.xlane.xlu1 %398 }
 0x271   :  { %v405_v41 = vmul.f32 0.0078125, %v399_v27  ;;  %v412_v42 = vmul.f32 %v408_v40, %v408_v40 }
 0x273   :  { %v409_v43 = vsub.f32 %v392_v33, %v405_v41  ;;  %417 = vadd.xlane.f32.xlu1 %v412_v42 }
 0x274   :  { %v401_v44 = vpop.xlane.xlu1 %400 }
 0x275   :  { %v406_v45 = vmul.f32 0.0078125, %v401_v44  ;;  %v413_v31 = vmul.f32 %v409_v43, %v409_v43 }
 0x277   :  { %v410_v46 = vsub.f32 %v393_v34, %v406_v45  ;;  %419 = vadd.xlane.f32.xlu0 %v413_v31 }
 0x279   :  { %v414_v32 = vmul.f32 %v410_v46, %v410_v46 }
 0x27b   :  { %421 = vadd.xlane.f32.xlu1 %v414_v32 }
 0x2fc   :  { %v416_v47 = vpop.xlane.xlu0 %415 }
 0x2fd   :  { %v423_v48 = vmul.f32 0.0078125, %v416_v47 }
 0x2ff   :  { %v427_v49 = vadd.f32 1e-05, %v423_v48 }
 0x300   :  { %v418_v50 = vpop.xlane.xlu1 %417 }
 0x301   :  { %573 = vrsqrt.f32 %v427_v49  ;;  %v424_v51 = vmul.f32 0.0078125, %v418_v50 }
 0x303   :  { %v428_v52 = vadd.f32 1e-05, %v424_v51 }
 0x304   :  { %v420_v53 = vpop.xlane.xlu0 %419 }
 0x305   :  { %575 = vrsqrt.f32 %v428_v52  ;;  %v425_v54 = vmul.f32 0.0078125, %v420_v53 }
 0x307   :  { %v429_v55 = vadd.f32 1e-05, %v425_v54 }
 0x308   :  { %v422_v56 = vpop.xlane.xlu1 %421 }
 0x309   :  { %577 = vrsqrt.f32 %v429_v55  ;;  %v426_v57 = vmul.f32 0.0078125, %v422_v56 }
 0x30b   :  { %v574_v58 = vpop.eup %573  ;;  %v430_v60 = vadd.f32 1e-05, %v426_v57 }
 0x30c   :  { %v435_v61 = vmul.f32 %v574_v58, %v407_v36 }
 0x30d   :  { %579 = vrsqrt.f32 %v430_v60 }
 0x30e   :  { %v446_v63 = vmul.f32 %v502_v59, %v435_v61 }
 0x30f   :  { %v576_v0 = vpop.eup %575 }
 0x310   :  { %v457_v1 = vadd.f32 %v503_v62, %v446_v63  ;;  %v436_v2 = vmul.f32 %v576_v0, %v408_v40 }
 0x312   :  { %461 = vst [vmem:[%s777_s7] sm:$0xff] %v457_v1  ;;  %v447_v3 = vmul.f32 %v502_v59, %v436_v2 }
 0x313   :  { %v578_v4 = vpop.eup %577 }
 0x314   :  { %v458_v5 = vadd.f32 %v503_v62, %v447_v3  ;;  %v437_v6 = vmul.f32 %v578_v4, %v409_v43 }
 0x316   :  { %462 = vst [vmem:[%s777_s7 + $0x8] sm:$0xff] %v458_v5  ;;  %v448_v7 = vmul.f32 %v502_v59, %v437_v6 }
 0x317   :  { %v580_v8 = vpop.eup %579 }
 0x318   :  { %v459_v9 = vadd.f32 %v503_v62, %v448_v7  ;;  %v438_v10 = vmul.f32 %v580_v8, %v410_v46 }
 0x31a   :  { %463 = vst [vmem:[%s777_s7 + $0x10] sm:$0xff] %v459_v9  ;;  %v449_v11 = vmul.f32 %v502_v59, %v438_v10 }
 0x31c   :  { %v460_v12 = vadd.f32 %v503_v62, %v449_v11 }
 0x31e   :  { %464 = vst [vmem:[%s777_s7 + $0x18] sm:$0xff] %v460_v12 }

// kernel: gpt_forward.11
= control target key start
LH: loop header
LB: loop body
LE: loop exit
PB: predicated region body
PF: predicated region fallthrough
CT: control target
= control target key end

     0   :  { %v360_v2 = vmov 0   ;;  %s453_s0 = inlined_call_operand.vmem [shape: bf16[32,128], index: 0, kind: input, shape index: {}]   ;;  %s454_s1 = inlined_call_operand.vmem [shape: bf16[128,256], index: 1, kind: input, shape index: {}]   ;;  %s455_s2 = inlined_call_operand.vmem [shape: f32[1,256], index: 2, kind: input, shape index: {}]   ;;  %s456_s3 = inlined_call_operand.hbm [shape: f32[32,256], index: 3, kind: output, shape index: {}]  }
   0x1   :  { %v310_v0 = vld [vmem:[%s454_s1 + $0x4] ss:$8 sps:$4 sm:$0xff]   ;;  %v312_v1 = vld [vmem:[%s454_s1] ss:$8 sps:$4 sm:$0xff]   ;;  %180 = vmatprep.mubr.bf16.mxu0 %v360_v2  ;;  %190 = vmatprep.mubr.bf16.mxu1 %v360_v2  ;;  %v313_v3 = vld [vmem:[%s454_s1 + $0x14] ss:$8 sps:$4 sm:$0xff]  }
   0x2   :  { %148 = vmatprep.subr.bf16.mxu0 %v310_v0  ;;  %290 = vmatprep.subr.bf16.mxu1 %v310_v0  ;;  %v315_v4 = vld [vmem:[%s454_s1 + $0x10] ss:$8 sps:$4 sm:$0xff]   ;;  %v316_v5 = vld [vmem:[%s454_s1 + $0x24] ss:$8 sps:$4 sm:$0xff]   ;;  %v318_v6 = vld [vmem:[%s454_s1 + $0x20] ss:$8 sps:$4 sm:$0xff]  }
   0x3   :  { %149 = vmatpush1.bf16.msra.mxu0 %v312_v1  ;;  %298 = vmatpush1.bf16.msra.mxu1 %v312_v1  ;;  %v319_v7 = vld [vmem:[%s454_s1 + $0x34] ss:$8 sps:$4 sm:$0xff]   ;;  %v321_v8 = vld [vmem:[%s454_s1 + $0x30] ss:$8 sps:$4 sm:$0xff]   ;;  %v322_v9 = vld [vmem:[%s454_s1 + $0x44] ss:$8 sps:$4 sm:$0xff]  }
   0x4   :  { %150 = vmatprep.subr.bf16.mxu0 %v313_v3  ;;  %291 = vmatprep.subr.bf16.mxu1 %v313_v3 }
   0x7   :  { %151 = vmatpush1.bf16.msra.mxu0 %v315_v4  ;;  %299 = vmatpush1.bf16.msra.mxu1 %v315_v4 }
   0x8   :  { %152 = vmatprep.subr.bf16.mxu0 %v316_v5  ;;  %292 = vmatprep.subr.bf16.mxu1 %v316_v5 }
   0xb   :  { %153 = vmatpush1.bf16.msra.mxu0 %v318_v6  ;;  %300 = vmatpush1.bf16.msra.mxu1 %v318_v6 }
   0xc   :  { %154 = vmatprep.subr.bf16.mxu0 %v319_v7  ;;  %293 = vmatprep.subr.bf16.mxu1 %v319_v7 }
   0xd   :  { %8 = vsyncpa [#allocation4], 0  ;;  %v324_v10 = vld [vmem:[%s454_s1 + $0x40] ss:$8 sps:$4 sm:$0xff]   ;;  %v325_v11 = vld [vmem:[%s454_s1 + $0x54] ss:$8 sps:$4 sm:$0xff]   ;;  %v230_v19 = vlaneseq }
   0xe   :  { %v327_v12 = vld [vmem:[%s454_s1 + $0x50] ss:$8 sps:$4 sm:$0xff]   ;;  %v328_v13 = vld [vmem:[%s454_s1 + $0x64] ss:$8 sps:$4 sm:$0xff]   ;;  %v330_v14 = vld [vmem:[%s454_s1 + $0x60] ss:$8 sps:$4 sm:$0xff]  }
   0xf   :  { %155 = vmatpush1.bf16.msra.mxu0 %v321_v8  ;;  %301 = vmatpush1.bf16.msra.mxu1 %v321_v8  ;;  %v331_v15 = vld [vmem:[%s454_s1 + $0x74] ss:$8 sps:$4 sm:$0xff]   ;;  %v333_v16 = vld [vmem:[%s454_s1 + $0x70] ss:$8 sps:$4 sm:$0xff]   ;;  %v334_v17 = vld [vmem:[%s453_s0] sm:$0xff]   ;;  %v231_v20 = vshrl.u32 %v230_v19, 7 }
  0x10   :  { %156 = vmatprep.subr.bf16.mxu0 %v322_v9  ;;  %294 = vmatprep.subr.bf16.mxu1 %v322_v9  ;;  %v335_v18 = vld [vmem:[%s453_s0 + $0x8] sm:$0xff]   ;;  %v228_v22 = vld [vmem:[%s455_s2] sm:$0x3]  ;;  %s361_s1 = smov [#allocation3]  }
  0x11   :  { %v232_v21 = vsub.s32 0, %v231_v20  ;;  %v236_v23 = vsub.s32 1, %v231_v20  ;;  %s261_s23 = sshll.u32 %s361_s1, 4  ;;  %s262_s23 = int_to_ptr.vmem [resolvable:$true] %s261_s23 }
  0x12   :  { %s336_s0 = scalar_lea.vmem %s262_s23, 1024  ;;  %p341_p1 = scmp.lt.s32.totalorder %s262_s23, %s262_s23 }
  0x13   :  { %157 = vmatpush1.bf16.msra.mxu0 %v324_v10  ;;  %302 = vmatpush1.bf16.msra.mxu1 %v324_v10  ;;  %v233_v24 = vrot.slane %v228_v22, %v232_v21  ;;  %v237_v25 = vrot.slane %v228_v22, %v236_v23  ;;  %p337_p0 = scmp.ne.s32.totalorder %s262_s23, %s336_s0  ;;  %p342_p2 = scmp.lt.s32.totalorder %s336_s0, %s336_s0 }
  0x14   :  { %158 = vmatprep.subr.bf16.mxu0 %v325_v11  ;;  %295 = vmatprep.subr.bf16.mxu1 %v325_v11 }
  0x15   :  { %p343_p3 = por %p342_p2, %p341_p1 }
  0x17   :  { %159 = vmatpush1.bf16.msra.mxu0 %v327_v12  ;;  %303 = vmatpush1.bf16.msra.mxu1 %v327_v12  ;;  %p344_p4 = pnand %p343_p3, %p337_p0 }
  0x18   :  { %160 = vmatprep.subr.bf16.mxu0 %v328_v13  ;;  %296 = vmatprep.subr.bf16.mxu1 %v328_v13 }
  0x1b   :  { %161 = vmatpush1.bf16.msra.mxu0 %v330_v14  ;;  %304 = vmatpush1.bf16.msra.mxu1 %v330_v14 }
  0x1c   :  { %162 = vmatprep.subr.bf16.mxu0 %v331_v15  ;;  %297 = vmatprep.subr.bf16.mxu1 %v331_v15 }
  0x1f   :  { %163 = vmatpush1.bf16.msra.mxu0 %v333_v16  ;;  %305 = vmatpush1.bf16.msra.mxu1 %v333_v16 }
  0x22   :  { %181 = vmatmul.mubr.bf16.vlgmr.msra.gmra.mrb[0].mxu0 %v334_v17  ;;  %191 = vmatmul.mubr.bf16.vlgmr.msra.gmra.mrb[0].mxu1 %v335_v18 }
  0xf5   :  { %v182_v26 = vpop.f32.mrb[0].mxu0  ;;  %v192_v27 = vpop.f32.mrb[0].mxu1 }
  0xf6   :  { %v240_v28 = vadd.f32 %v233_v24, %v182_v26  ;;  %v244_v29 = vadd.f32 %v233_v24, %v192_v27  ;;  %v184_v30 = vpop.f32.mrb[1].mxu0  ;;  %v194_v31 = vpop.f32.mrb[1].mxu1 }
  0xf7   :  { %v241_v32 = vadd.f32 %v237_v25, %v184_v30  ;;  %v245_v33 = vadd.f32 %v237_v25, %v194_v31  ;;  %v186_v34 = vpop.f32.mrb[2].mxu0  ;;  %v196_v35 = vpop.f32.mrb[2].mxu1 }
  0xf8   :  { %248 = vst [vmem:[#allocation3] sm:$0xff] %v240_v28  ;;  %252 = vst [vmem:[#allocation3 + $0x20] sm:$0xff] %v244_v29  ;;  %v242_v36 = vadd.f32 %v233_v24, %v186_v34  ;;  %v246_v37 = vadd.f32 %v233_v24, %v196_v35  ;;  %v188_v38 = vpop.f32.mrb[3].mxu0  ;;  %v198_v39 = vpop.f32.mrb[3].mxu1 }
  0xf9   :  { %249 = vst [vmem:[#allocation3 + $0x8] sm:$0xff] %v241_v32  ;;  %253 = vst [vmem:[#allocation3 + $0x28] sm:$0xff] %v245_v33  ;;  %v243_v40 = vadd.f32 %v237_v25, %v188_v38  ;;  %v247_v41 = vadd.f32 %v237_v25, %v198_v39 }
  0xfa   :  { %250 = vst [vmem:[#allocation3 + $0x10] sm:$0xff] %v242_v36  ;;  %254 = vst [vmem:[#allocation3 + $0x30] sm:$0xff] %v246_v37 }
  0xfb   :  { %251 = vst [vmem:[#allocation3 + $0x18] sm:$0xff] %v243_v40  ;;  %255 = vst [vmem:[#allocation3 + $0x38] sm:$0xff] %v247_v41 }
  0xfc   :  { %347 = shalt.err (!%p344_p4)
}
  0xfd   :  { %s348_s25 = scalar_lea.hbm %s456_s3, 1024 }
  0xfe   :  { %p349_p5 = scmp.ne.s32.totalorder %s456_s3, %s348_s25  ;;  %p352_p6 = scmp.lt.u32.totalorder %s348_s25, %s456_s3 }
 0x100   :  { %p354_p7 = pnand %p352_p6, %p349_p5 }
 0x102   :  { %357 = shalt.err (!%p354_p7)
}
 0x103   :  { %s362_s30 = smov 256   ;;  %s363_s4 = smov 16  }
 0x104   :  { %267 = dma.vmem_to_hbm [thread:$0]  %s262_s23, 1024, %s456_s3, [#allocation4], %s362_s30, %s362_s30, %s363_s4  }
 0x105   :  { %358 = dma.done.wait [#allocation4], 1024  }
 0x106   :  { %359 = vsyncadd [#allocation4], 4294966272 }
 0x107   :  { %271 = vsyncpa [#allocation4], 1 }

// kernel: gpt_forward.6
= control target key start
LH: loop header
LB: loop body
LE: loop exit
PB: predicated region body
PF: predicated region fallthrough
CT: control target
= control target key end

     0   :  { %s1729_s24 = smov 0   ;;  %s1998_s0 = inlined_call_operand.vmem [shape: f32[2,16,128], index: 0, kind: input, shape index: {}]   ;;  %s1999_s1 = inlined_call_operand.vmem [shape: bf16[128,384], index: 1, kind: input, shape index: {}]   ;;  %s2000_s2 = inlined_call_operand.vmem [shape: f32[1,384], index: 2, kind: input, shape index: {}]   ;;  %s2001_s3 = inlined_call_operand.vmem [shape: bf16[128,128], index: 3, kind: input, shape index: {}]   ;;  %s2002_s4 = inlined_call_operand.vmem [shape: f32[1,128], index: 4, kind: input, shape index: {}]   ;;  %s2003_s5 = inlined_call_operand.vmem [shape: f32[1,128], index: 5, kind: input, shape index: {}]   ;;  %s2004_s6 = inlined_call_operand.vmem [shape: f32[1,128], index: 6, kind: input, shape index: {}]   ;;  %s2005_s7 = inlined_call_operand.vmem [shape: f32[2,16,128], index: 7, kind: output, shape index: {}]  }
   0x1 LB: > { %s1388_s25 = sadd.s32 4294967295, %s1681_s24   ;;  %p1392_p0 = scmp.ge.s32.totalorder %s1681_s24, 1  ;;  %s1681_s24 = sphi %s1729_s24, %s17_s24  }
   0x2   : > { %p237_p1 = scmp.lt.s32.totalorder %s1681_s24, 3 }
   0x4   : > { %p238_p2 = pnand %p1392_p0, %p237_p1 }
   0x5   : > { %v1599_v0 = vld [vmem:[%s1999_s1 + $0x4] ss:$12 sps:$4 sm:$0xff] (!%p238_p2)   ;;  %v1601_v1 = vld [vmem:[%s1999_s1] ss:$12 sps:$4 sm:$0xff] (!%p238_p2)   ;;  %v1683_v2 = vmov (!%p238_p2), 0   ;;  %p269_p3 = scmp.lt.s32.totalorder (!%p238_p2), %s1388_s25, 1  ;;  %v317_v21 = vlaneseq (!%p238_p2) }
   0x6   : > { %241 = sbr.rel (%p238_p2) target bundleno = 2958 (0xb8e), region = 48  ;;  %492 = vmatprep.mubr.bf16.mxu0 (!%p238_p2), %v1683_v2  ;;  %460 = vmatprep.subr.bf16.mxu0 (!%p238_p2), %v1599_v0  ;;  %v1602_v3 = vld [vmem:[%s1999_s1 + $0x1c] ss:$12 sps:$4 sm:$0xff] (!%p238_p2)   ;;  %v1604_v4 = vld [vmem:[%s1999_s1 + $0x18] ss:$12 sps:$4 sm:$0xff] (!%p238_p2)   ;;  %v1684_v20 = vmov (!%p238_p2), 0.0  }
   0x7   : > { %461 = vmatpush1.bf16.msra.mxu0 (!%p238_p2), %v1601_v1  ;;  %v1605_v5 = vld [vmem:[%s1999_s1 + $0x34] ss:$12 sps:$4 sm:$0xff] (!%p238_p2)   ;;  %v1607_v6 = vld [vmem:[%s1999_s1 + $0x30] ss:$12 sps:$4 sm:$0xff] (!%p238_p2)   ;;  %v1608_v7 = vld [vmem:[%s1999_s1 + $0x4c] ss:$12 sps:$4 sm:$0xff] (!%p238_p2)   ;;  %1485 = vmatprep.subr.bf16.mxu1 (!%p238_p2), %v1684_v20 }
   0x8   : > { %462 = vmatprep.subr.bf16.mxu0 (!%p238_p2), %v1602_v3  ;;  %v1610_v8 = vld [vmem:[%s1999_s1 + $0x48] ss:$12 sps:$4 sm:$0xff] (!%p238_p2)   ;;  %v1611_v9 = vld [vmem:[%s1999_s1 + $0x64] ss:$12 sps:$4 sm:$0xff] (!%p238_p2)   ;;  %v1613_v10 = vld [vmem:[%s1999_s1 + $0x60] ss:$12 sps:$4 sm:$0xff] (!%p238_p2)  }
   0x9   : > { %v1614_v11 = vld [vmem:[%s1999_s1 + $0x7c] ss:$12 sps:$4 sm:$0xff] (!%p238_p2)   ;;  %v1616_v12 = vld [vmem:[%s1999_s1 + $0x78] ss:$12 sps:$4 sm:$0xff] (!%p238_p2)   ;;  %v1617_v13 = vld [vmem:[%s1999_s1 + $0x94] ss:$12 sps:$4 sm:$0xff] (!%p238_p2)  }
   0xa   : > { %v1619_v14 = vld [vmem:[%s1999_s1 + $0x90] ss:$12 sps:$4 sm:$0xff] (!%p238_p2)   ;;  %v1620_v15 = vld [vmem:[%s1999_s1 + $0xac] ss:$12 sps:$4 sm:$0xff] (!%p238_p2)   ;;  %v1622_v16 = vld [vmem:[%s1999_s1 + $0xa8] ss:$12 sps:$4 sm:$0xff] (!%p238_p2)  }
   0xb   : > { %463 = vmatpush1.bf16.msra.mxu0 (!%p238_p2), %v1604_v4  ;;  %vm1685_vm0 = vmmov (!%p238_p2), 0   ;;  %v1808_v22 = vshrl.u32 (!%p238_p2), %v317_v21, 7  ;;  %v1814_v24 = vld [vmem:[%s2000_s2] sm:$0x7] (!%p238_p2)  ;;  %vm564_vm1 = vcmask (!%p238_p2), 261120   ;;  %s1686_s21 = smov (!%p238_p2), 96  }
   0xc   : > { %464 = vmatprep.subr.bf16.mxu0 (!%p238_p2), %v1605_v5  ;;  %1501 = vmatprep.mubr.msk.bf16.mxu1 (!%p238_p2), %vm1685_vm0, %v1684_v20  ;;  %v1623_v41 = vld [vmem:[%s1999_s1 + $0x8] ss:$12 sps:$4 sm:$0xff] (!%p238_p2)   ;;  %v1624_v42 = vld [vmem:[%s1999_s1 + $0x20] ss:$12 sps:$4 sm:$0xff] (!%p238_p2)   ;;  %v1625_v43 = vld [vmem:[%s1999_s1 + $0x38] ss:$12 sps:$4 sm:$0xff] (!%p238_p2)  }
   0xd   : > { %s2007_s25 = smov (!%p269_p3, %s1388_s25), 1  ;;  %v319_v23 = vsub.s32 0, %v1808_v22  ;;  %v323_v25 = vsub.s32 1, %v1808_v22  ;;  %1486 = vmatpush3.bf16.msra.mxu1 %v1623_v41  ;;  %v1626_v44 = vld [vmem:[%s1999_s1 + $0x50] ss:$12 sps:$4 sm:$0xff]   ;;  %vm612_vm2 = vcmask 130048  }
   0xe   : > { %s1446_s17 = sshll.u32 %s2007_s25, 4  ;;  %1487 = vmatprep.subr.bf16.mxu1 %v1684_v20  ;;  %v1627_v45 = vld [vmem:[%s1999_s1 + $0x68] ss:$12 sps:$4 sm:$0xff]   ;;  %v1628_v48 = vld [vmem:[%s1999_s1 + $0x80] ss:$12 sps:$4 sm:$0xff]   ;;  %s1687_s18 = smov 64  }
   0xf   : > { %465 = vmatpush1.bf16.msra.mxu0 %v1607_v6  ;;  %s273_s15 = scalar_lea.vmem %s1998_s0, %s1446_s17  ;;  %v320_v26 = vrot.slane %v1814_v24, %v319_v23  ;;  %v324_v28 = vrot.slane %v1814_v24, %v323_v25  ;;  %v1629_v49 = vld [vmem:[%s1999_s1 + $0x98] ss:$12 sps:$4 sm:$0xff]   ;;  %v1630_v51 = vld [vmem:[%s1999_s1 + $0xb0] ss:$12 sps:$4 sm:$0xff]   ;;  %v327_v6 = vsub.s32 2, %v1808_v22  ;;  %s1688_s29 = smov 32  }
  0x10   : > { %466 = vmatprep.subr.bf16.mxu0 %v1608_v7  ;;  %v1793_v17 = vld [vmem:[%s273_s15] sm:$0xff]  ;;  %v1795_v18 = vld [vmem:[%s273_s15 + $0x8] sm:$0xff]  ;;  %v1633_v41 = vld [vmem:[%s2001_s3 + $0x10] sm:$0xff]   ;;  %s278_s26 = scalar_lea.vmem %s2005_s7, %s1446_s17 }
  0x11   : > { %v1799_v19 = vpack.c.bf16 %v1795_v18, %v1793_v17  ;;  %1488 = vmatpush3.bf16.msra.mxu1 %v1624_v42  ;;  %v1634_v42 = vld [vmem:[%s2001_s3 + $0x18] sm:$0xff]  }
  0x12   : > { %1489 = vmatprep.subr.bf16.mxu1 %v1684_v20 }
  0x13   : > { %467 = vmatpush1.bf16.msra.mxu0 %v1610_v8 }
  0x14   : > { %468 = vmatprep.subr.bf16.mxu0 %v1611_v9  ;;  %v328_v9 = vrot.slane %v1814_v24, %v327_v6 }
  0x15   : > { %1490 = vmatpush3.bf16.msra.mxu1 %v1625_v43 }
  0x16   : > { %1491 = vmatprep.subr.bf16.mxu1 %v1684_v20 }
  0x17   : > { %469 = vmatpush1.bf16.msra.mxu0 %v1613_v10 }
  0x18   : > { %470 = vmatprep.subr.bf16.mxu0 %v1614_v11 }
  0x19   : > { %1492 = vmatpush3.bf16.msra.mxu1 %v1626_v44 }
  0x1a   : > { %1493 = vmatprep.subr.bf16.mxu1 %v1684_v20 }
  0x1b   : > { %471 = vmatpush1.bf16.msra.mxu0 %v1616_v12 }
  0x1c   : > { %472 = vmatprep.subr.bf16.mxu0 %v1617_v13 }
  0x1d   : > { %1494 = vmatpush3.bf16.msra.mxu1 %v1627_v45 }
  0x1e   : > { %1495 = vmatprep.subr.bf16.mxu1 %v1684_v20 }
  0x1f   : > { %473 = vmatpush1.bf16.msra.mxu0 %v1619_v14 }
  0x20   : > { %474 = vmatprep.subr.bf16.mxu0 %v1620_v15 }
  0x21   : > { %1496 = vmatpush3.bf16.msra.mxu1 %v1628_v48 }
  0x22   : > { %1497 = vmatprep.subr.bf16.mxu1 %v1684_v20 }
  0x23   : > { %475 = vmatpush1.bf16.msra.mxu0 %v1622_v16 }
  0x24   : > { %1505 = vmatprep.subr.bf16.mxu0 %v1684_v20 }
  0x25   : > { %1498 = vmatpush3.bf16.msra.mxu1 %v1629_v49 }
  0x26   : > { %493 = vmatmul.mubr.bf16.vlgmr.msra.gmra.mrb[0].mxu0 %v1799_v19  ;;  %1499 = vmatprep.subr.bf16.mxu1 %v1684_v20 }
  0x27   : > { %1507 = vmatprep.mubr.msk.bf16.mxu0 %vm1685_vm0, %v1684_v20 }
  0x29   : > { %1500 = vmatpush3.bf16.msra.mxu1 %v1630_v51 }
  0x2a   : > { %1511 = vmatprep.subr.bf16.mxu1 %v1684_v20 }
  0x2c   : > { %1502 = vmatmul.mubr.bf16.vlgmr.msra.gmra.mrb[0].mxu1 %v1799_v19 }
  0x2d   : > { %1513 = vmatprep.mubr.msk.bf16.mxu1 %vm1685_vm0, %v1684_v20 }
  0xf9   : > { %v494_v27 = vpop.f32.mrb[0].mxu0 }
  0xfa   : > { %v495_v29 = vadd.f32 %v494_v27, %v320_v26  ;;  %v496_v30 = vpop.f32.mrb[1].mxu0 }
  0xfb   : > { %v498_v31 = vpop.f32.mrb[2].mxu0  ;;  %v497_v34 = vadd.f32 %v496_v30, %v324_v28 }
  0xfc   : > { %v499_v32 = vadd.f32 %v498_v31, %v320_v26  ;;  %v500_v33 = vpop.f32.mrb[3].mxu0  ;;  %v560_v36 = vmul.f32 0.17677669, %v495_v29 }
  0xfd   : > { %v501_v35 = vadd.f32 %v500_v33, %v324_v28 }
  0xfe   : > { %v561_v37 = vmul.f32 0.17677669, %v499_v32 }
  0xff   : > { %v1819_v38 = vpack.c.bf16 %v501_v35, %v497_v34  ;;  %v537_v7 = vpop.f32.mrb[0].mxu1 }
 0x100   : > { %v1821_v39 = vpack.c.bf16 %v561_v37, %v560_v36  ;;  %v1503_v8 = vpop.f32.mrb[1].mxu1  ;;  %v538_v12 = vadd.f32 %v537_v7, %v328_v9 }
 0x101   : > { %686 = vrot.lane.b32.xlu0 %v1819_v38, %s1686_s21  ;;  %v569_v40 = vsel %vm564_vm1, %v1819_v38, 0  ;;  %v540_v10 = vpop.f32.mrb[2].mxu1 }
 0x102   : > { %1506 = vmatpush3.bf16.xpose.msra.mxu0 %v569_v40  ;;  %v1504_v11 = vpop.f32.mrb[3].mxu1  ;;  %v541_v13 = vadd.f32 %v540_v10, %v328_v9 }
 0x103   : > { %1517 = vmatprep.subr.bf16.mxu0 %v1684_v20 }
 0x104   : > { %v1882_v14 = vpack.c.bf16 %v541_v13, %v538_v12 }
 0x105   : > { %683 = vrot.lane.b32.xlu0 %v1821_v39, %s1686_s21 }
 0x106   : > { %1512 = vmatpush3.bf16.msra.mxu1 %v1882_v14 }
 0x107   : > { %1523 = vmatprep.subr.bf16.mxu1 %v1684_v20 }
 0x109   : > { %1508 = vmatmul.mubr.msk.bf16.vlgmr.msra.gmra.mrb[4].mxu0 %vm564_vm1, %v1821_v39 }
 0x10a   : > { %1519 = vmatprep.mubr.msk.bf16.mxu0 %vm1685_vm0, %v1684_v20 }
 0x173   : > { %v687_v46 = vpop.permute.xlu0 %686 }
 0x174   : > { %v692_v47 = vsel %vm564_vm1, %v687_v46, 0 }
 0x175   : > { %1518 = vmatpush3.bf16.xpose.msra.mxu0 %v692_v47 }
 0x176   : > { %1529 = vmatprep.subr.bf16.mxu0 %v1684_v20 }
 0x177   : > { %v684_v50 = vpop.permute.xlu0 %683 }
 0x17c   : > { %1520 = vmatmul.mubr.msk.bf16.vlgmr.msra.gmra.mrb[8].mxu0 %vm564_vm1, %v684_v50  ;;  %v1631_v50 = vld [vmem:[%s2001_s3] sm:$0xff]  }
 0x17d   : > { %1533 = vmatprep.mubr.msk.bf16.mxu0 %vm1685_vm0, %v1684_v20  ;;  %1530 = vmatpush3.bf16.msra.mxu0 %v1633_v41 }
 0x17e   : > { %1531 = vmatprep.subr.bf16.mxu0 %v1684_v20 }
 0x181   : > { %1532 = vmatpush3.bf16.msra.mxu0 %v1634_v42 }
 0x182   : > { %1545 = vmatprep.subr.bf16.mxu0 %v1684_v20 }
 0x1dc   : > { %v605_v52 = vpop.f32.mrb[4].mxu0 }
 0x1dd   : > { %v1509_v53 = vpop.f32.mrb[5].mxu0  ;;  %v613_v54 = vsel %vm612_vm2, %v605_v52, -inf }
 0x1de   : > { %614 = vmax.xlane.f32.xlu1 %v613_v54  ;;  %v608_v55 = vpop.f32.mrb[6].mxu0 }
 0x1df   : > { %v1510_v56 = vpop.f32.mrb[7].mxu0  ;;  %v616_v57 = vsel %vm612_vm2, %v608_v55, -inf }
 0x1e2   : > { %617 = vmax.xlane.f32.xlu1 %v616_v57 }
 0x24f   : > { %v728_v58 = vpop.f32.mrb[8].mxu0 }
 0x250   : > { %v1521_v59 = vpop.f32.mrb[9].mxu0  ;;  %v735_v60 = vsel %vm612_vm2, %v728_v58, -inf }
 0x251   : > { %736 = vmax.xlane.f32.xlu0 %v735_v60  ;;  %v731_v61 = vpop.f32.mrb[10].mxu0 }
 0x252   : > { %v1522_v62 = vpop.f32.mrb[11].mxu0  ;;  %v738_v63 = vsel %vm612_vm2, %v731_v61, -inf }
 0x253   : > { %739 = vmax.xlane.f32.xlu1 %v738_v63 }
 0x267   : > { %921 = vrot.lane.b32.xlu0 %v1819_v38, %s1687_s18 }
 0x26b   : > { %v615_v0 = vpop.xlane.xlu1 %614 }
 0x26c   : > { %v619_v1 = vsub.f32 %v605_v52, %v615_v0  ;;  %v1632_v52 = vld [vmem:[%s2001_s3 + $0x8] sm:$0xff]  }
 0x26e   : > { %v621_v2 = vmul.f32 1.442695, %v619_v1 }
 0x26f   : > { %v618_v3 = vpop.xlane.xlu1 %617 }
 0x270   : > { %1639 = vpow2.f32 %v621_v2  ;;  %v620_v4 = vsub.f32 %v608_v55, %v618_v3 }
 0x272   : > { %v623_v5 = vmul.f32 1.442695, %v620_v4 }
 0x274   : > { %1641 = vpow2.f32 %v623_v5 }
 0x27a   : > { %v1640_v15 = vpop.eup %1639 }
 0x27b   : > { %v625_v16 = vsel %vm612_vm2, %v1640_v15, 0.0 }
 0x27c   : > { %626 = vadd.xlane.f32.xlu1 %v625_v16 }
 0x27e   : > { %v1642_v19 = vpop.eup %1641 }
 0x27f   : > { %v628_v21 = vsel %vm612_vm2, %v1642_v19, 0.0 }
 0x280   : > { %629 = vadd.xlane.f32.xlu1 %v628_v21 }
 0x2de   : > { %v737_v22 = vpop.xlane.xlu0 %736 }
 0x2df   : > { %v741_v23 = vsub.f32 %v728_v58, %v737_v22 }
 0x2e0   : > { %v740_v24 = vpop.xlane.xlu1 %739 }
 0x2e1   : > { %v743_v25 = vmul.f32 1.442695, %v741_v23  ;;  %v742_v26 = vsub.f32 %v731_v61, %v740_v24 }
 0x2e2   : > { %v922_v60 = vpop.permute.xlu0 %921 }
 0x2e3   : > { %1643 = vpow2.f32 %v743_v25  ;;  %v745_v27 = vmul.f32 1.442695, %v742_v26  ;;  %v927_v0 = vsel %vm564_vm1, %v922_v60, 0 }
 0x2e5   : > { %1645 = vpow2.f32 %v745_v27 }
 0x2ed   : > { %v1644_v28 = vpop.eup %1643 }
 0x2ee   : > { %v747_v29 = vsel %vm612_vm2, %v1644_v28, 0.0 }
 0x2ef   : > { %v1646_v30 = vpop.eup %1645  ;;  %748 = vadd.xlane.f32.xlu1 %v747_v29 }
 0x2f0   : > { %v750_v31 = vsel %vm612_vm2, %v1646_v30, 0.0 }
 0x2f3   : > { %751 = vadd.xlane.f32.xlu1 %v750_v31 }
 0x304   : > { %759 = vrot.lane.b32.xlu1 %v1882_v14, %s1686_s21 }
 0x308   : > { %919 = vrot.lane.b32.xlu1 %v1821_v39, %s1687_s18 }
 0x309   : > { %v627_v32 = vpop.xlane.xlu1 %626 }
 0x30a   : > { %1647 = vrcp.f32 %v627_v32 }
 0x30d   : > { %v630_v33 = vpop.xlane.xlu1 %629 }
 0x30e   : > { %1649 = vrcp.f32 %v630_v33  ;;  %v1635_v33 = vld [vmem:[%s2001_s3 + $0x20] sm:$0xff]  }
 0x314   : > { %v1648_v34 = vpop.eup %1647 }
 0x315   : > { %v633_v36 = vmul.f32 %v1648_v34, %v1640_v15 }
 0x318   : > { %v1650_v35 = vpop.eup %1649 }
 0x319   : > { %v634_v37 = vmul.f32 %v1650_v35, %v1642_v19 }
 0x31b   : > { %v635_v40 = vpack.c.bf16 %v634_v37, %v633_v36 }
 0x31d   : > { %1514 = vmatmul.mubr.msk.bf16.vlgmr.msra.gmra.mrb[4].mxu1 %vm612_vm2, %v635_v40 }
 0x31e   : > { %1525 = vmatprep.mubr.msk.bf16.mxu1 %vm1685_vm0, %v1684_v20 }
 0x37c   : > { %v749_v43 = vpop.xlane.xlu1 %748 }
 0x37d   : > { %1651 = vrcp.f32 %v749_v43 }
 0x380   : > { %v752_v44 = vpop.xlane.xlu1 %751 }
 0x381   : > { %1653 = vrcp.f32 %v752_v44  ;;  %v1636_v44 = vld [vmem:[%s2001_s3 + $0x28] sm:$0xff]  }
 0x384   : > { %v760_v45 = vpop.permute.xlu1 %759 }
 0x385   : > { %1524 = vmatpush3.bf16.msra.mxu1 %v760_v45 }
 0x386   : > { %1537 = vmatprep.subr.bf16.mxu1 %v1684_v20 }
 0x387   : > { %v1652_v46 = vpop.eup %1651 }
 0x388   : > { %v755_v48 = vmul.f32 %v1652_v46, %v1644_v28  ;;  %v920_v1 = vpop.permute.xlu1 %919 }
 0x38b   : > { %v1654_v47 = vpop.eup %1653 }
 0x38c   : > { %v756_v49 = vmul.f32 %v1654_v47, %v1646_v30 }
 0x38e   : > { %v757_v51 = vpack.c.bf16 %v756_v49, %v755_v48 }
 0x390   : > { %1526 = vmatmul.mubr.msk.bf16.vlgmr.msra.gmra.mrb[8].mxu1 %vm612_vm2, %v757_v51 }
 0x391   : > { %1538 = vmatpush3.bf16.msra.mxu1 %v1631_v50  ;;  %1541 = vmatprep.mubr.msk.bf16.mxu1 %vm1685_vm0, %v1684_v20 }
 0x392   : > { %1539 = vmatprep.subr.bf16.mxu1 %v1684_v20 }
 0x395   : > { %1540 = vmatpush3.bf16.msra.mxu1 %v1632_v52 }
 0x396   : > { %1551 = vmatprep.subr.bf16.mxu1 %v1684_v20 }
 0x3f0   : > { %v674_v53 = vpop.f32.mrb[4].mxu1 }
 0x3f1   : > { %v1515_v54 = vpop.f32.mrb[5].mxu1 }
 0x3f2   : > { %v677_v55 = vpop.f32.mrb[6].mxu1 }
 0x3f3   : > { %v681_v56 = vpack.c.bf16 %v677_v55, %v674_v53  ;;  %v1516_v57 = vpop.f32.mrb[7].mxu1 }
 0x3f5   : > { %1542 = vmatmul.mubr.msk.bf16.vlgmr.msra.gmra.mrb[12].mxu1 %vm564_vm1, %v681_v56 }
 0x3f6   : > { %1553 = vmatprep.mubr.msk.bf16.mxu1 %vm1685_vm0, %v1684_v20 }
 0x463   : > { %v799_v58 = vpop.f32.mrb[8].mxu1 }
 0x464   : > { %v1527_v59 = vpop.f32.mrb[9].mxu1 }
 0x465   : > { %v802_v61 = vpop.f32.mrb[10].mxu1 }
 0x466   : > { %v806_v62 = vpack.c.bf16 %v802_v61, %v799_v58  ;;  %v1528_v63 = vpop.f32.mrb[11].mxu1 }
 0x468   : > { %1534 = vmatmul.mubr.msk.bf16.vlgmr.msra.gmra.mrb[12].mxu0 %vm564_vm1, %v806_v62 }
 0x469   : > { %1546 = vmatpush3.bf16.xpose.msra.mxu0 %v927_v0  ;;  %1547 = vmatprep.mubr.msk.bf16.mxu0 %vm1685_vm0, %v1684_v20 }
 0x46a   : > { %1557 = vmatprep.subr.bf16.mxu0 %v1684_v20 }
 0x470   : > { %1548 = vmatmul.mubr.msk.bf16.vlgmr.msra.gmra.mrb[16].mxu0 %vm564_vm1, %v920_v1 }
 0x471   : > { %1561 = vmatprep.mubr.msk.bf16.mxu0 %vm1685_vm0, %v1684_v20  ;;  %1558 = vmatpush3.bf16.msra.mxu0 %v1635_v33 }
 0x472   : > { %1559 = vmatprep.subr.bf16.mxu0 %v1684_v20 }
 0x475   : > { %1560 = vmatpush3.bf16.msra.mxu0 %v1636_v44 }
 0x476   : > { %1571 = vmatprep.subr.bf16.mxu0 %v1684_v20 }
 0x4c8   : > { %v912_v2 = vpop.f32.mrb[12].mxu1 }
 0x4c9   : > { %v1543_v3 = vpop.f32.mrb[13].mxu1 }
 0x4ca   : > { %v915_v4 = vpop.f32.mrb[14].mxu1 }
 0x4cb   : > { %v1544_v5 = vpop.f32.mrb[15].mxu1 }
 0x53b   : > { %v856_v6 = vpop.f32.mrb[12].mxu0 }
 0x53c   : > { %v1928_v7 = vadd.f32 %v912_v2, %v856_v6  ;;  %v1535_v8 = vpop.f32.mrb[13].mxu0 }
 0x53d   : > { %v859_v9 = vpop.f32.mrb[14].mxu0 }
 0x53e   : > { %v1930_v10 = vadd.f32 %v915_v4, %v859_v9  ;;  %v1536_v11 = vpop.f32.mrb[15].mxu0 }
 0x543   : > { %v963_v12 = vpop.f32.mrb[16].mxu0 }
 0x544   : > { %v1549_v13 = vpop.f32.mrb[17].mxu0  ;;  %v970_v15 = vsel %vm612_vm2, %v963_v12, -inf }
 0x545   : > { %971 = vmax.xlane.f32.xlu1 %v970_v15  ;;  %v966_v16 = vpop.f32.mrb[18].mxu0 }
 0x546   : > { %v1550_v19 = vpop.f32.mrb[19].mxu0  ;;  %v973_v21 = vsel %vm612_vm2, %v966_v16, -inf }
 0x547   : > { %974 = vmax.xlane.f32.xlu0 %v973_v21 }
 0x55d   : > { %993 = vrot.lane.b32.xlu0 %v1882_v14, %s1687_s18 }
 0x5d2   : > { %v972_v22 = vpop.xlane.xlu1 %971 }
 0x5d3   : > { %v976_v23 = vsub.f32 %v963_v12, %v972_v22 }
 0x5d4   : > { %v975_v24 = vpop.xlane.xlu0 %974 }
 0x5d5   : > { %v978_v25 = vmul.f32 1.442695, %v976_v23  ;;  %v977_v26 = vsub.f32 %v966_v16, %v975_v24 }
 0x5d7   : > { %1655 = vpow2.f32 %v978_v25  ;;  %v980_v27 = vmul.f32 1.442695, %v977_v26  ;;  %v1441_v26 = vld [vmem:[%s2002_s4] ss:$0 sm:$0xff] }
 0x5d8   : > { %v994_v28 = vpop.permute.xlu0 %993 }
 0x5d9   : > { %1657 = vpow2.f32 %v980_v27  ;;  %1552 = vmatpush3.bf16.msra.mxu1 %v994_v28 }
 0x5da   : > { %1565 = vmatprep.subr.bf16.mxu1 %v1684_v20 }
 0x5e1   : > { %v1656_v29 = vpop.eup %1655 }
 0x5e2   : > { %v982_v30 = vsel %vm612_vm2, %v1656_v29, 0.0 }
 0x5e3   : > { %v1658_v31 = vpop.eup %1657  ;;  %983 = vadd.xlane.f32.xlu1 %v982_v30 }
 0x5e4   : > { %v985_v32 = vsel %vm612_vm2, %v1658_v31, 0.0 }
 0x5e7   : > { %986 = vadd.xlane.f32.xlu1 %v985_v32 }
 0x5f8   : > { %1101 = vrot.lane.b32.xlu1 %v1819_v38, %s1688_s29 }
 0x5fc   : > { %1099 = vrot.lane.b32.xlu1 %v1821_v39, %s1688_s29 }
 0x670   : > { %v984_v34 = vpop.xlane.xlu1 %983 }
 0x671   : > { %1659 = vrcp.f32 %v984_v34 }
 0x674   : > { %v987_v35 = vpop.xlane.xlu1 %986 }
 0x675   : > { %1661 = vrcp.f32 %v987_v35 }
 0x678   : > { %v1102_v42 = vpop.permute.xlu1 %1101 }
 0x679   : > { %v1107_v43 = vsel %vm564_vm1, %v1102_v42, 0 }
 0x67b   : > { %v1660_v36 = vpop.eup %1659 }
 0x67c   : > { %v990_v40 = vmul.f32 %v1660_v36, %v1656_v29  ;;  %v1100_v39 = vpop.permute.xlu1 %1099 }
 0x67f   : > { %v1662_v37 = vpop.eup %1661 }
 0x680   : > { %v991_v41 = vmul.f32 %v1662_v37, %v1658_v31 }
 0x682   : > { %v992_v38 = vpack.c.bf16 %v991_v41, %v990_v40 }
 0x684   : > { %1554 = vmatmul.mubr.msk.bf16.vlgmr.msra.gmra.mrb[16].mxu1 %vm612_vm2, %v992_v38 }
 0x685   : > { %1566 = vmatpush3.bf16.xpose.msra.mxu1 %v1107_v43  ;;  %1567 = vmatprep.mubr.msk.bf16.mxu1 %vm1685_vm0, %v1684_v20 }
 0x686   : > { %1577 = vmatprep.subr.bf16.mxu1 %v1684_v20 }
 0x68c   : > { %1568 = vmatmul.mubr.msk.bf16.vlgmr.msra.gmra.mrb[20].mxu1 %vm564_vm1, %v1100_v39 }
 0x68d   : > { %1581 = vmatprep.mubr.msk.bf16.mxu1 %vm1685_vm0, %v1684_v20 }
 0x757   : > { %v1033_v45 = vpop.f32.mrb[16].mxu1 }
 0x758   : > { %v1555_v46 = vpop.f32.mrb[17].mxu1 }
 0x759   : > { %v1036_v47 = vpop.f32.mrb[18].mxu1 }
 0x75a   : > { %v1040_v48 = vpack.c.bf16 %v1036_v47, %v1033_v45  ;;  %v1556_v49 = vpop.f32.mrb[19].mxu1 }
 0x75b   : > { %v1442_v49 = vld [vmem:[%s2003_s5] ss:$0 sm:$0xff] }
 0x75c   : > { %1562 = vmatmul.mubr.msk.bf16.vlgmr.msra.gmra.mrb[20].mxu0 %vm564_vm1, %v1040_v48 }
 0x75d   : > { %1573 = vmatprep.mubr.msk.bf16.mxu0 %vm1685_vm0, %v1684_v20 }
 0x75f   : > { %v1143_v50 = vpop.f32.mrb[20].mxu1 }
 0x760   : > { %v1569_v51 = vpop.f32.mrb[21].mxu1  ;;  %v1150_v52 = vsel %vm612_vm2, %v1143_v50, -inf }
 0x761   : > { %1151 = vmax.xlane.f32.xlu0 %v1150_v52  ;;  %v1146_v53 = vpop.f32.mrb[22].mxu1  ;;  %v1443_v51 = vld [vmem:[%s2004_s6] ss:$0 sm:$0xff] }
 0x762   : > { %v1570_v54 = vpop.f32.mrb[23].mxu1  ;;  %v1153_v55 = vsel %vm612_vm2, %v1146_v53, -inf }
 0x763   : > { %1154 = vmax.xlane.f32.xlu1 %v1153_v55 }
 0x774   : > { %1173 = vrot.lane.b32.xlu1 %v1882_v14, %s1688_s29  ;;  %v1637_v14 = vld [vmem:[%s2001_s3 + $0x30] sm:$0xff]  }
 0x775   : > { %1578 = vmatpush3.bf16.msra.mxu1 %v1637_v14 }
 0x776   : > { %1579 = vmatprep.subr.bf16.mxu1 %v1684_v20  ;;  %v1638_v20 = vld [vmem:[%s2001_s3 + $0x38] sm:$0xff]  }
 0x779   : > { %1580 = vmatpush3.bf16.msra.mxu1 %v1638_v20 }
 0x7ee   : > { %v1152_v56 = vpop.xlane.xlu0 %1151 }
 0x7ef   : > { %v1156_v57 = vsub.f32 %v1143_v50, %v1152_v56 }
 0x7f0   : > { %v1155_v58 = vpop.xlane.xlu1 %1154 }
 0x7f1   : > { %v1158_v59 = vmul.f32 1.442695, %v1156_v57  ;;  %v1157_v60 = vsub.f32 %v1146_v53, %v1155_v58 }
 0x7f3   : > { %1663 = vpow2.f32 %v1158_v59  ;;  %v1160_v61 = vmul.f32 1.442695, %v1157_v60 }
 0x7f4   : > { %v1174_v62 = vpop.permute.xlu1 %1173 }
 0x7f5   : > { %1665 = vpow2.f32 %v1160_v61  ;;  %1572 = vmatpush3.bf16.msra.mxu0 %v1174_v62 }
 0x7fd   : > { %v1664_v63 = vpop.eup %1663 }
 0x7fe   : > { %v1162_v0 = vsel %vm612_vm2, %v1664_v63, 0.0 }
 0x7ff   : > { %v1666_v1 = vpop.eup %1665  ;;  %1163 = vadd.xlane.f32.xlu0 %v1162_v0 }
 0x800   : > { %v1165_v2 = vsel %vm612_vm2, %v1666_v1, 0.0 }
 0x803   : > { %1166 = vadd.xlane.f32.xlu0 %v1165_v2 }
 0x82f   : > { %v1090_v3 = vpop.f32.mrb[20].mxu0 }
 0x830   : > { %v1097_v4 = vadd.f32 %v1090_v3, %v1928_v7  ;;  %v1563_v5 = vpop.f32.mrb[21].mxu0 }
 0x831   : > { %v1093_v6 = vpop.f32.mrb[22].mxu0 }
 0x832   : > { %v1098_v8 = vadd.f32 %v1093_v6, %v1930_v10  ;;  %v1564_v9 = vpop.f32.mrb[23].mxu0 }
 0x88c   : > { %v1164_v11 = vpop.xlane.xlu0 %1163 }
 0x88d   : > { %1667 = vrcp.f32 %v1164_v11 }
 0x890   : > { %v1167_v12 = vpop.xlane.xlu0 %1166 }
 0x891   : > { %1669 = vrcp.f32 %v1167_v12 }
 0x897   : > { %v1668_v13 = vpop.eup %1667 }
 0x898   : > { %v1170_v16 = vmul.f32 %v1668_v13, %v1664_v63 }
 0x89b   : > { %v1670_v15 = vpop.eup %1669 }
 0x89c   : > { %v1171_v19 = vmul.f32 %v1670_v15, %v1666_v1 }
 0x89e   : > { %v1172_v21 = vpack.c.bf16 %v1171_v19, %v1170_v16 }
 0x8a0   : > { %1574 = vmatmul.mubr.msk.bf16.vlgmr.msra.gmra.mrb[24].mxu0 %vm612_vm2, %v1172_v21 }
 0x973   : > { %v1213_v7 = vpop.f32.mrb[24].mxu0 }
 0x974   : > { %v1575_v22 = vpop.f32.mrb[25].mxu0 }
 0x975   : > { %v1216_v10 = vpop.f32.mrb[26].mxu0 }
 0x976   : > { %v1220_v23 = vpack.c.bf16 %v1216_v10, %v1213_v7  ;;  %v1576_v24 = vpop.f32.mrb[27].mxu0 }
 0x978   : > { %1582 = vmatmul.mubr.msk.bf16.vlgmr.msra.gmra.mrb[24].mxu1 %vm564_vm1, %v1220_v23 }
 0xa4b   : > { %v1270_v25 = vpop.f32.mrb[24].mxu1 }
 0xa4c   : > { %v1277_v27 = vadd.f32 %v1270_v25, %v1097_v4  ;;  %v1583_v28 = vpop.f32.mrb[25].mxu1 }
 0xa4d   : > { %v1273_v29 = vpop.f32.mrb[26].mxu1 }
 0xa4e   : > { %v1286_v30 = vadd.f32 %v1441_v26, %v1277_v27  ;;  %v1278_v31 = vadd.f32 %v1273_v29, %v1098_v8  ;;  %v1584_v32 = vpop.f32.mrb[27].mxu1 }
 0xa50   : > { %v1287_v33 = vadd.f32 %v1441_v26, %v1278_v31  ;;  %v1288_v34 = vadd.f32 %v1286_v30, %v1793_v17 }
 0xa52   : > { %1290 = vadd.xlane.f32.xlu0 %v1288_v34  ;;  %v1289_v35 = vadd.f32 %v1287_v33, %v1795_v18 }
 0xa56   : > { %1292 = vadd.xlane.f32.xlu0 %v1289_v35 }
 0xadf   : > { %v1291_v36 = vpop.xlane.xlu0 %1290 }
 0xae0   : > { %v1295_v37 = vmul.f32 0.0078125, %v1291_v36 }
 0xae2   : > { %v1297_v40 = vsub.f32 %v1288_v34, %v1295_v37 }
 0xae3   : > { %v1293_v41 = vpop.xlane.xlu0 %1292 }
 0xae4   : > { %v1296_v42 = vmul.f32 0.0078125, %v1293_v41  ;;  %v1299_v38 = vmul.f32 %v1297_v40, %v1297_v40 }
 0xae6   : > { %v1298_v43 = vsub.f32 %v1289_v35, %v1296_v42  ;;  %1301 = vadd.xlane.f32.xlu0 %v1299_v38 }
 0xae8   : > { %v1300_v39 = vmul.f32 %v1298_v43, %v1298_v43 }
 0xaea   : > { %1303 = vadd.xlane.f32.xlu0 %v1300_v39 }
 0xb73   : > { %v1302_v44 = vpop.xlane.xlu0 %1301 }
 0xb74   : > { %v1305_v45 = vmul.f32 0.0078125, %v1302_v44 }
 0xb76   : > { %v1307_v46 = vadd.f32 1e-05, %v1305_v45 }
 0xb77   : > { %v1304_v47 = vpop.xlane.xlu0 %1303 }
 0xb78   : > { %1671 = vrsqrt.f32 %v1307_v46  ;;  %v1306_v17 = vmul.f32 0.0078125, %v1304_v47 }
 0xb7a   : > { %v1308_v48 = vadd.f32 1e-05, %v1306_v17 }
 0xb7c   : > { %1673 = vrsqrt.f32 %v1308_v48 }
 0xb82   : > { %v1672_v18 = vpop.eup %1671 }
 0xb83   : > { %v1311_v50 = vmul.f32 %v1672_v18, %v1297_v40 }
 0xb85   : > { %v1320_v52 = vmul.f32 %v1442_v49, %v1311_v50 }
 0xb86   : > { %v1674_v53 = vpop.eup %1673 }
 0xb87   : > { %v1329_v54 = vadd.f32 %v1443_v51, %v1320_v52  ;;  %v1312_v55 = vmul.f32 %v1674_v53, %v1298_v43 }
 0xb89   : > { %1331 = vst [vmem:[%s278_s26] sm:$0xff] %v1329_v54  ;;  %v1321_v56 = vmul.f32 %v1442_v49, %v1312_v55 }
 0xb8b   : > { %v1330_v57 = vadd.f32 %v1443_v51, %v1321_v56 }
 0xb8d   : > { %1332 = vst [vmem:[%s278_s26 + $0x8] sm:$0xff] %v1330_v57 }
 0xb8e PF: > { %s17_s24 = sadd.s32 1, %s1681_s24  }
 0xb8f   : > { %p14_p4 = scmp.ge.s32.totalorder %s17_s24, 4  }
 0xb91   :  { %16 = sbr.rel (!%p14_p4) target bundleno = 1 (0x1), region = 78 }

</bundles_post_ra>
